<compile_context>
chip_gen: v6e
topology: v6e:2x2x1
jax: 0.10.0
libtpu: 0.0.40
codegen_flags: <defaults>
</compile_context>

<pallas_src>
import jax
import jax.numpy as jnp
from jax import lax
from jax.experimental import pallas as pl
from jax.experimental.pallas import tpu as pltpu


# ----------------------------- fused head kernel -----------------------------

def head_kernel(x_ref, w_ref, o_ref):
    # x_ref: (T, C) f32 ; w_ref: (C, 3H) bf16 laid out [Wq.T | Wk.T | Wv.T] ; o_ref: (T, H) f32
    T, C = x_ref.shape
    H = o_ref.shape[-1]
    scale = float(C) ** -0.5                       # n_embd**-0.5, matching the PyTorch module

    # Single wide MXU pass for all three projections (f32 accumulation).
    xb = x_ref[...].astype(jnp.bfloat16)
    qkv = jnp.dot(xb, w_ref[...], preferred_element_type=jnp.float32)    # (T, 3H) f32
    q = qkv[:, :H]
    k = qkv[:, H:2 * H]
    v = qkv[:, 2 * H:]

    # Scores: contract on the head axis (no explicit transpose); scale in f32 after the matmul.
    s = lax.dot_general(q.astype(jnp.bfloat16), k.astype(jnp.bfloat16),
                        (((1,), (1,)), ((), ())),
                        preferred_element_type=jnp.float32) * scale       # (T, T) f32

    # Causal mask.
    row = lax.broadcasted_iota(jnp.int32, (T, T), 0)
    col = lax.broadcasted_iota(jnp.int32, (T, T), 1)
    s = jnp.where(col <= row, s, -jnp.inf)

    # Full softmax in f32 (everything is resident, no online rescaling needed).
    m = jnp.max(s, axis=-1, keepdims=True)
    p = jnp.exp(s - m)
    l = jnp.sum(p, axis=-1, keepdims=True)

    o = jnp.dot(p.astype(jnp.bfloat16), v.astype(jnp.bfloat16),
                preferred_element_type=jnp.float32)                       # (T, H) f32
    o_ref[...] = (o * pl.reciprocal(l, approx=True)).astype(o_ref.dtype)


# --------------------------------- wrapper ------------------------------------

def pack_head_weights(wk, wq, wv):
    """Pre-pack PyTorch-layout (H, C) weights into one fused (C, 3H) bf16 matrix [q | k | v].
    Do this once per model, outside the per-call forward wrapper."""
    w = jnp.concatenate(
        [jnp.asarray(wq).T, jnp.asarray(wk).T, jnp.asarray(wv).T], axis=1)
    return w.astype(jnp.bfloat16)


def head_forward(x, w_fused, head_size):
    """x: (B, T, C) float32.  w_fused: (C, 3*head_size) bf16 from pack_head_weights."""
    B, T, C = x.shape
    H = head_size
    assert w_fused.shape == (C, 3 * H)

    # One grid step per batch element: the (T, C) row block, the (T, T) f32 scores and all
    # intermediates total ~2 MiB at the module's context_window (256), far under the VMEM budget
    # on every TPU generation (incl. v7x's 64 MiB), so no kv tiling / online softmax is needed.
    return pl.pallas_call(
        head_kernel,
        out_shape=jax.ShapeDtypeStruct((B, T, H), x.dtype),
        grid_spec=pltpu.PrefetchScalarGridSpec(
            num_scalar_prefetch=0,
            grid=(B,),
            in_specs=[
                pl.BlockSpec((pl.Squeezed(), T, C), lambda b: (b, 0, 0)),
                pl.BlockSpec((C, 3 * H), lambda b: (0, 0)),
            ],
            out_specs=pl.BlockSpec((pl.Squeezed(), T, H), lambda b: (b, 0, 0)),
        ),
        compiler_params=pltpu.CompilerParams(
            dimension_semantics=("parallel",),
        ),
    )(x, w_fused)


# -------------------------------- reference ------------------------------------

def head_reference(x, wk, wq, wv):
    """Pure-JAX reference matching the PyTorch forward (eval mode)."""
    B, T, C = x.shape
    k = x @ wk.T
    q = x @ wq.T
    v = x @ wv.T
    wei = (q @ jnp.swapaxes(k, -2, -1)) * (C ** -0.5)
    mask = jnp.tril(jnp.ones((T, T), dtype=bool))
    wei = jnp.where(mask, wei, -jnp.inf)
    wei = jax.nn.softmax(wei, axis=-1)
    return wei @ v


if __name__ == "__main__":
    # Shapes consistent with the module (context_window=256, n_embd=384), small batch,
    # head_size = n_embd // 6 = 64.
    B, T, C, H = 2, 256, 384, 64

    key = jax.random.PRNGKey(0)
    kx, kk, kq, kv = jax.random.split(key, 4)

    x = jax.random.normal(kx, (B, T, C), dtype=jnp.float32)
    bound = 1.0 / (C ** 0.5)
    wk = jax.random.uniform(kk, (H, C), jnp.float32, -bound, bound)
    wq = jax.random.uniform(kq, (H, C), jnp.float32, -bound, bound)
    wv = jax.random.uniform(kv, (H, C), jnp.float32, -bound, bound)

    w_fused = pack_head_weights(wk, wq, wv)        # one-time weight packing
    out = head_forward(x, w_fused, head_size=H)
    out = jax.block_until_ready(out)

    ref = head_reference(x, wk, wq, wv)
    assert out.shape == (B, T, H)
    max_err = float(jnp.max(jnp.abs(out - ref)))
    assert jnp.allclose(out, ref, atol=2e-2, rtol=2e-2), f"mismatch vs reference, max|err|={max_err}"

    print("KERNEL_OK")
</pallas_src>

<mosaic_0001>
module attributes {stable_mosaic.version = 11 : i64} {
  func.func @head_kernel(%arg0: i32, %arg1: memref<1x256x384xf32, #tpu.memory_space<vmem>>, %arg2: memref<384x192xbf16, #tpu.memory_space<vmem>>, %arg3: memref<1x256x64xf32, #tpu.memory_space<vmem>>) attributes {dimension_semantics = [#tpu.dimension_semantics<parallel>], iteration_bounds = array<i64: 2>, scalar_prefetch = 0 : i64, scratch_operands = 0 : i64, tpu.core_type = #tpu.core_type<tc>, window_params = [{transform_indices = @transform_0, window_bounds = array<i64: 1, 256, 384>}, {pipeline_mode = #tpu.pipeline_mode<synchronous>, transform_indices = @transform_1, window_bounds = array<i64: 384, 192>}, {transform_indices = @transform_2, window_bounds = array<i64: 1, 256, 64>}]} {
    %c0 = arith.constant 0 : index
    %c0_0 = arith.constant 0 : index
    %c0_1 = arith.constant 0 : index
    %0 = vector.load %arg1[%c0, %c0_0, %c0_1] : memref<1x256x384xf32, #tpu.memory_space<vmem>>, vector<1x256x384xf32>
    %1 = vector.shape_cast %0 : vector<1x256x384xf32> to vector<256x384xf32>
    %2 = arith.truncf %1 : vector<256x384xf32> to vector<256x384xbf16>
    %c0_2 = arith.constant 0 : index
    %c0_3 = arith.constant 0 : index
    %3 = vector.load %arg2[%c0_2, %c0_3] : memref<384x192xbf16, #tpu.memory_space<vmem>>, vector<384x192xbf16>
    %cst = arith.constant dense<0.000000e+00> : vector<256x192xf32>
    %4 = tpu.matmul %2, %3, %cst {dimension_numbers = #tpu.dot_dimension_numbers<[1], [0], [0], [1], [0, 0, 1, 1], [], []>} : vector<256x384xbf16>, vector<384x192xbf16>, vector<256x192xf32> -> vector<256x192xf32>
    %5 = vector.extract_strided_slice %4 {offsets = [0, 0], sizes = [256, 64], strides = [1, 1]} : vector<256x192xf32> to vector<256x64xf32>
    %6 = vector.extract_strided_slice %4 {offsets = [0, 64], sizes = [256, 64], strides = [1, 1]} : vector<256x192xf32> to vector<256x64xf32>
    %7 = vector.extract_strided_slice %4 {offsets = [0, 128], sizes = [256, 64], strides = [1, 1]} : vector<256x192xf32> to vector<256x64xf32>
    %8 = arith.truncf %5 : vector<256x64xf32> to vector<256x64xbf16>
    %9 = arith.truncf %6 : vector<256x64xf32> to vector<256x64xbf16>
    %cst_4 = arith.constant dense<0.000000e+00> : vector<256x256xf32>
    %10 = tpu.matmul %8, %9, %cst_4 {dimension_numbers = #tpu.dot_dimension_numbers<[1], [1], [0], [0], [0, 0, 1, 0], [], []>} : vector<256x64xbf16>, vector<256x64xbf16>, vector<256x256xf32> -> vector<256x256xf32>
    %cst_5 = arith.constant 0.0510310382 : f32
    %11 = vector.broadcast %cst_5 : f32 to vector<256x256xf32>
    %12 = arith.mulf %10, %11 : vector<256x256xf32>
    %13 = tpu.iota {dimensions = array<i32: 0>} : vector<256x256xi32>
    %14 = tpu.iota {dimensions = array<i32: 1>} : vector<256x256xi32>
    %15 = arith.cmpi sle, %14, %13 : vector<256x256xi32>
    %cst_6 = arith.constant 0xFF800000 : f32
    %16 = vector.broadcast %cst_6 : f32 to vector<256x256xf32>
    %17 = arith.select %15, %12, %16 : vector<256x256xi1>, vector<256x256xf32>
    %cst_7 = arith.constant dense<0xFF800000> : vector<256xf32>
    %18 = vector.multi_reduction <maximumf>, %17, %cst_7 [1] : vector<256x256xf32> to vector<256xf32>
    %19 = vector.shape_cast %18 : vector<256xf32> to vector<256x1xf32>
    %20 = vector.broadcast %19 : vector<256x1xf32> to vector<256x256xf32>
    %21 = arith.subf %17, %20 : vector<256x256xf32>
    %22 = math.exp %21 : vector<256x256xf32>
    %cst_8 = arith.constant dense<0.000000e+00> : vector<256xf32>
    %23 = vector.multi_reduction <add>, %22, %cst_8 [1] : vector<256x256xf32> to vector<256xf32>
    %24 = vector.shape_cast %23 : vector<256xf32> to vector<256x1xf32>
    %25 = arith.truncf %22 : vector<256x256xf32> to vector<256x256xbf16>
    %26 = arith.truncf %7 : vector<256x64xf32> to vector<256x64xbf16>
    %cst_9 = arith.constant dense<0.000000e+00> : vector<256x64xf32>
    %27 = tpu.matmul %25, %26, %cst_9 {dimension_numbers = #tpu.dot_dimension_numbers<[1], [0], [0], [1], [0, 0, 1, 1], [], []>} : vector<256x256xbf16>, vector<256x64xbf16>, vector<256x64xf32> -> vector<256x64xf32>
    %28 = tpu.reciprocal %24 {approx = true} : vector<256x1xf32> -> vector<256x1xf32>
    %29 = vector.broadcast %28 : vector<256x1xf32> to vector<256x64xf32>
    %30 = arith.mulf %27, %29 : vector<256x64xf32>
    %c0_10 = arith.constant 0 : index
    %c0_11 = arith.constant 0 : index
    %c0_12 = arith.constant 0 : index
    %31 = vector.load %arg3[%c0_10, %c0_11, %c0_12] : memref<1x256x64xf32, #tpu.memory_space<vmem>>, vector<1x256x64xf32>
    %32 = vector.shape_cast %31 : vector<1x256x64xf32> to vector<256x64xf32>
    %33 = vector.shape_cast %30 : vector<256x64xf32> to vector<1x256x64xf32>
    tpu.vector_store %arg3[%c0_10, %c0_11, %c0_12], %33 {strides = array<i32>} : memref<1x256x64xf32, #tpu.memory_space<vmem>>, vector<1x256x64xf32>,
    return
  }
  func.func @transform_0(%arg0: i32) -> (i32, i32, i32) {
    %c0_i32 = arith.constant 0 : i32
    %c0_i32_0 = arith.constant 0 : i32
    %c0_i32_1 = arith.constant 0 : i32
    return %arg0, %c0_i32, %c0_i32_0 : i32, i32, i32
  }
  func.func @transform_1(%arg0: i32) -> (i32, i32) {
    %c0_i32 = arith.constant 0 : i32
    %c0_i32_0 = arith.constant 0 : i32
    %c0_i32_1 = arith.constant 0 : i32
    return %c0_i32, %c0_i32_0 : i32, i32
  }
  func.func @transform_2(%arg0: i32) -> (i32, i32, i32) {
    %c0_i32 = arith.constant 0 : i32
    %c0_i32_0 = arith.constant 0 : i32
    %c0_i32_1 = arith.constant 0 : i32
    return %arg0, %c0_i32, %c0_i32_0 : i32, i32, i32
  }
}

</mosaic_0001>

<bundles_post_ra>
// kernel: tpu_custom_call.1
= control target key start
LH: loop header
LB: loop body
LE: loop exit
PB: predicated region body
PF: predicated region fallthrough
CT: control target
= control target key end

     0   :  { %7 = vsyncpa [#allocation3], 0  ;;  %s3947_s0 = inlined_call_operand.hbm [shape: f32[2,256,384], index: 0, kind: input, shape index: {}]   ;;  %s3948_s1 = inlined_call_operand.vmem [shape: bf16[384,192], index: 1, kind: input, shape index: {}]   ;;  %s3949_s2 = inlined_call_operand.vmem [shape: f32[2,256,64], index: 2, kind: output, shape index: {}]  }
   0x1   :  { %9 = vsyncpa [#allocation3 + $0x1], 0  ;;  %s2973_s9 = smov 0   ;;  %s2975_s10 = smov 0  }
   0x2   :  { %s2977_s11 = smov 0   ;;  %s2979_s12 = smov 0  }
   0x3 LB: > { %s2992_s13 = sadd.s32 4294967295, %s2951_s12   ;;  %s2995_s14 = sadd.s32 1, %s2951_s12   ;;  %s2951_s12 = sphi %s2979_s12, %s4005_s12   ;;  %s2947_s11 = sphi %s2977_s11, %s4004_s11   ;;  %s2943_s10 = sphi %s2975_s10, %s4003_s10   ;;  %s2939_s9 = sphi %s2973_s9, %s4002_s9  }
   0x4   : > { %s19_s15 = ssub.s32 %s2951_s12, %s2995_s14  ;;  %s22_s16 = sadd.s32 1, %s2947_s11 }
   0x5   : > { %p20_p0 = scmp.eq.s32.totalorder %s19_s15, 0  ;;  %p29_p1 = scmp.ne.s32.totalorder %s2947_s11, %s2943_s10 }
   0x6   : > { %p30_p2 = scmp.eq.s32.totalorder %s2951_s12, 0  ;;  %p35_p3 = scmp.ne.s32.totalorder %s2943_s10, %s2939_s9 }
   0x7   : > { %s3005_s17 = scalar_select %p20_p0, %s2947_s11, %s22_s16  }
   0x8   : > { %p31_p4 = por %p30_p2, %p29_p1  ;;  %p36_p5 = scmp.eq.s32.totalorder %s2992_s13, 0 }
   0x9   : > { %p2588_p6 = scmp.lt.s32.totalorder %s2951_s12, 2  ;;  %s109_s19 = sand.u32 1, %s2947_s11  }
   0xa   : > { %p3009_p7 = por %p36_p5, %p35_p3  ;;  %s2579_s20 = smul.u32 768, %s109_s19 }
   0xb   : > { %s2580_s21 = smul.u32 12288, %s2951_s12  ;;  %p3015_p8 = pnand %p2588_p6, %p31_p4 }
   0xc   : > { %s3964_s18 = scalar_select %p3009_p7, 1, 0 }
   0xd   : > { %s3022_s25 = scalar_lea.hbm %s3947_s0, %s2580_s21  ;;  %s113_s26 = scalar_lea.vmem [#allocation2], %s2579_s20 }
   0xe   : > { %s120_s27 = sshll.u32 %s113_s26, 4  ;;  %s3027_s28 = scalar_lea.sflag [#allocation3], %s109_s19  ;;  %s3024_s27 = int_to_ptr.vmem [resolvable:$true] %s120_s27 }
   0xf   : > { %s2889_s29 = scalar_lea.hbm %s3022_s25, 12288  ;;  %p2891_p11 = pneg %p3015_p8 }
  0x10   : > { %p2890_p10 = scmp.ne.s32.totalorder %s3022_s25, %s2889_s29  ;;  %s2894_s4 = scalar_lea.hbm %s3947_s0, 24576 }
  0x11   : > { %p2895_p0 = scmp.lt.s32.totalorder %s3022_s25, %s3947_s0  ;;  %p2896_p1 = scmp.lt.s32.totalorder %s2894_s4, %s2889_s29 }
  0x12   : > { %p2892_p12 = pnand %p2891_p11, %p2890_p10 }
  0x13   : > { %p2897_p2 = por %p2896_p1, %p2895_p0 }
  0x14   : > { %p2893_p13 = pneg %p2892_p12 }
  0x16   : > { %p2898_p3 = pnand %p2897_p2, %p2893_p13 }
  0x18   : > { %2901 = shalt.err (!%p2898_p3)
}
  0x19   : > { %s2902_s7 = scalar_lea.vmem %s3024_s27, 12288  ;;  %s2953_s8 = smov [#allocation2]  }
  0x1a   : > { %p2903_p4 = scmp.ne.s32.totalorder %s3024_s27, %s2902_s7  ;;  %s2907_s9 = sshll.u32 %s2953_s8, 4  ;;  %s2908_s9 = int_to_ptr.vmem [resolvable:$false] %s2907_s9 }
  0x1b   : > { %s2909_s15 = scalar_lea.vmem %s2908_s9, 24576  ;;  %p2910_p10 = scmp.lt.s32.totalorder %s3024_s27, %s2908_s9 }
  0x1c   : > { %p2905_p5 = pnand %p2903_p4, %p2891_p11  ;;  %p2911_p12 = scmp.lt.s32.totalorder %s2909_s15, %s2902_s7 }
  0x1e   : > { %p2906_p6 = pneg %p2905_p5  ;;  %p2912_p9 = por %p2911_p12, %p2910_p10 }
  0x20   : > { %p2913_p7 = pnand %p2912_p9, %p2906_p6 }
  0x22   : > { %2916 = shalt.err (!%p2913_p7)
}
  0x23   : > { %s2954_s16 = smov 384   ;;  %s2955_s19 = smov 24  }
  0x24   : > { %2587 = dma.hbm_to_vmem [thread:$0]  (!%p3015_p8), %s3022_s25, 12288, %s3024_s27, %s3027_s28, %s2954_s16, %s2954_s16, %s2955_s19  }
  0x25   : > { %p128_p11 = scmp.lt.s32.totalorder %s2951_s12, 3  ;;  %p3966_p13 = scmp.ge.s32.totalorder %s2951_s12, 1 }
  0x27   : > { %p129_p0 = pnand %p3966_p13, %p128_p11 }
  0x29   : > { %132 = sbr.rel (%p129_p0) target bundleno = 1306 (0x51a), region = 28 }
  0x2e   : > { %s134_s20 = sand.u32 1, %s2943_s10   ;;  %p3967_p7 = scmp.ne.s32.totalorder %s3964_s18, 0 }
  0x2f   : > { %s2581_s21 = smul.u32 768, %s134_s20  ;;  %s135_s23 = scalar_lea.sflag [#allocation3], %s134_s20 }
  0x31   : > { %s3052_s24 = scalar_lea.vmem [#allocation2], %s2581_s21 }
  0x32   : > { %2934 = dma.done.wait (%p3967_p7), %s135_s23, 12288  }
  0x33   : > { %2936 = vsyncadd (%p3967_p7), %s135_s23, 4294955008  ;;  %v2956_v0 = vmov 0   ;;  %v2625_v1 = vld [vmem:[%s3948_s1 + $0x74] ss:$8 sps:$4 sm:$0xff]   ;;  %v2627_v2 = vld [vmem:[%s3948_s1 + $0x70] ss:$8 sps:$4 sm:$0xff]  }
  0x34   : > { %822 = vmatprep.mubr.bf16.mxu1 %v2956_v0  ;;  %597 = vmatprep.subr.bf16.mxu0 %v2625_v1  ;;  %v2628_v3 = vld [vmem:[%s3948_s1 + $0x64] ss:$8 sps:$4 sm:$0xff]   ;;  %v2630_v4 = vld [vmem:[%s3948_s1 + $0x60] ss:$8 sps:$4 sm:$0xff]   ;;  %v2631_v5 = vld [vmem:[%s3948_s1 + $0x54] ss:$8 sps:$4 sm:$0xff]  }
  0x35   : > { %598 = vmatpush1.bf16.msra.mxu0 %v2627_v2  ;;  %v2633_v6 = vld [vmem:[%s3948_s1 + $0x50] ss:$8 sps:$4 sm:$0xff]   ;;  %v2634_v7 = vld [vmem:[%s3948_s1 + $0x44] ss:$8 sps:$4 sm:$0xff]   ;;  %v2646_v8 = vld [vmem:[%s3948_s1 + $0x174] ss:$8 sps:$4 sm:$0xff]  }
  0x36   : > { %599 = vmatprep.subr.bf16.mxu0 %v2628_v3  ;;  %v2648_v9 = vld [vmem:[%s3948_s1 + $0x170] ss:$8 sps:$4 sm:$0xff]   ;;  %v2636_v10 = vld [vmem:[%s3948_s1 + $0x40] ss:$8 sps:$4 sm:$0xff]   ;;  %v2637_v11 = vld [vmem:[%s3948_s1 + $0x34] ss:$8 sps:$4 sm:$0xff]   ;;  %790 = vmatprep.subr.bf16.mxu1 %v2646_v8 }
  0x37   : > { %v2652_v12 = vld [vmem:[%s3948_s1 + $0x164] ss:$8 sps:$4 sm:$0xff]   ;;  %791 = vmatpush1.bf16.msra.mxu1 %v2648_v9  ;;  %v2654_v13 = vld [vmem:[%s3948_s1 + $0x160] ss:$8 sps:$4 sm:$0xff]   ;;  %v2639_v14 = vld [vmem:[%s3948_s1 + $0x30] ss:$8 sps:$4 sm:$0xff]  }
  0x38   : > { %792 = vmatprep.subr.bf16.mxu1 %v2652_v12  ;;  %v2658_v15 = vld [vmem:[%s3948_s1 + $0x154] ss:$8 sps:$4 sm:$0xff]   ;;  %v2640_v16 = vld [vmem:[%s3948_s1 + $0x24] ss:$8 sps:$4 sm:$0xff]   ;;  %v2660_v17 = vld [vmem:[%s3948_s1 + $0x150] ss:$8 sps:$4 sm:$0xff]  }
  0x39   : > { %600 = vmatpush1.bf16.msra.mxu0 %v2630_v4  ;;  %v2664_v18 = vld [vmem:[%s3948_s1 + $0x144] ss:$8 sps:$4 sm:$0xff]   ;;  %v2642_v19 = vld [vmem:[%s3948_s1 + $0x20] ss:$8 sps:$4 sm:$0xff]   ;;  %v2643_v20 = vld [vmem:[%s3948_s1 + $0x14] ss:$8 sps:$4 sm:$0xff]  }
  0x3a   : > { %601 = vmatprep.subr.bf16.mxu0 %v2631_v5  ;;  %v2666_v21 = vld [vmem:[%s3948_s1 + $0x140] ss:$8 sps:$4 sm:$0xff]   ;;  %v2670_v22 = vld [vmem:[%s3948_s1 + $0x134] ss:$8 sps:$4 sm:$0xff]   ;;  %v2645_v23 = vld [vmem:[%s3948_s1 + $0x10] ss:$8 sps:$4 sm:$0xff]  }
  0x3b   : > { %793 = vmatpush1.bf16.msra.mxu1 %v2654_v13  ;;  %v2649_v24 = vld [vmem:[%s3948_s1 + $0x4] ss:$8 sps:$4 sm:$0xff]   ;;  %v2672_v25 = vld [vmem:[%s3948_s1 + $0x130] ss:$8 sps:$4 sm:$0xff]   ;;  %v2651_v27 = vld [vmem:[%s3948_s1] ss:$8 sps:$4 sm:$0xff]  }
  0x3c   : > { %794 = vmatprep.subr.bf16.mxu1 %v2658_v15  ;;  %v2676_v26 = vld [vmem:[%s3948_s1 + $0x124] ss:$8 sps:$4 sm:$0xff]   ;;  %v2655_v28 = vld [vmem:[%s3948_s1 + $0xf4] ss:$8 sps:$4 sm:$0xff]   ;;  %v2678_v29 = vld [vmem:[%s3948_s1 + $0x120] ss:$8 sps:$4 sm:$0xff]  }
  0x3d   : > { %602 = vmatpush1.bf16.msra.mxu0 %v2633_v6  ;;  %v2682_v30 = vld [vmem:[%s3948_s1 + $0x114] ss:$8 sps:$4 sm:$0xff]   ;;  %v2657_v31 = vld [vmem:[%s3948_s1 + $0xf0] ss:$8 sps:$4 sm:$0xff]   ;;  %v2661_v32 = vld [vmem:[%s3948_s1 + $0xe4] ss:$8 sps:$4 sm:$0xff]  }
  0x3e   : > { %603 = vmatprep.subr.bf16.mxu0 %v2634_v7  ;;  %v166_v33 = vld [vmem:[%s3052_s24 + $0x8] sm:$0xff]  ;;  %v2684_v34 = vld [vmem:[%s3948_s1 + $0x110] ss:$8 sps:$4 sm:$0xff]   ;;  %v169_v35 = vld [vmem:[%s3052_s24 + $0x20] sm:$0xff]  ;;  %vm1047_vm0 = vcmask 523264   ;;  %p159_p8 = scmp.lt.s32.totalorder %s2992_s13, 1 }
  0x3f   : > { %795 = vmatpush1.bf16.msra.mxu1 %v2660_v17  ;;  %v2688_v36 = vld [vmem:[%s3948_s1 + $0x104] ss:$8 sps:$4 sm:$0xff]   ;;  %v262_v37 = vpack.c.bf16 %v169_v35, %v166_v33  ;;  %v2663_v38 = vld [vmem:[%s3948_s1 + $0xe0] ss:$8 sps:$4 sm:$0xff]   ;;  %v2667_v39 = vld [vmem:[%s3948_s1 + $0xd4] ss:$8 sps:$4 sm:$0xff]  }
  0x40   : > { %796 = vmatprep.subr.bf16.mxu1 %v2664_v18  ;;  %v2690_v40 = vld [vmem:[%s3948_s1 + $0x100] ss:$8 sps:$4 sm:$0xff]   ;;  %v167_v41 = vld [vmem:[%s3052_s24 + $0x10] sm:$0xff]  ;;  %v2673_v44 = vld [vmem:[%s3948_s1 + $0xc4] ss:$8 sps:$4 sm:$0xff]   ;;  %s4007_s13 = smov (!%p159_p8, %s2992_s13), 1 }
  0x41   : > { %604 = vmatpush1.bf16.msra.mxu0 %v2636_v10  ;;  %629 = vmatprep.mubr.bf16.mxu0 %v262_v37  ;;  %v170_v42 = vld [vmem:[%s3052_s24 + $0x28] sm:$0xff]  ;;  %v2669_v43 = vld [vmem:[%s3948_s1 + $0xd0] ss:$8 sps:$4 sm:$0xff]   ;;  %v2679_v47 = vld [vmem:[%s3948_s1 + $0xb4] ss:$8 sps:$4 sm:$0xff]   ;;  %s2394_s30 = sshll.u32 %s4007_s13, 8 }
  0x42   : > { %605 = vmatprep.subr.bf16.mxu0 %v2637_v11  ;;  %v263_v45 = vpack.c.bf16 %v170_v42, %v167_v41  ;;  %v2675_v46 = vld [vmem:[%s3948_s1 + $0xc0] ss:$8 sps:$4 sm:$0xff]   ;;  %v176_v49 = vld [vmem:[%s3052_s24 + $0x58] sm:$0xff]  ;;  %v2685_v51 = vld [vmem:[%s3948_s1 + $0xa4] ss:$8 sps:$4 sm:$0xff]   ;;  %s3868_s5 = scalar_lea.vmem %s3949_s2, %s2394_s30 }
  0x43   : > { %797 = vmatpush1.bf16.msra.mxu1 %v2666_v21  ;;  %v173_v48 = vld [vmem:[%s3052_s24 + $0x40] sm:$0xff]  ;;  %v2681_v50 = vld [vmem:[%s3948_s1 + $0xb0] ss:$8 sps:$4 sm:$0xff]   ;;  %v2691_v54 = vld [vmem:[%s3948_s1 + $0x94] ss:$8 sps:$4 sm:$0xff]  }
  0x44   : > { %798 = vmatprep.subr.bf16.mxu1 %v2670_v22  ;;  %v266_v52 = vpack.c.bf16 %v176_v49, %v173_v48  ;;  %v2687_v53 = vld [vmem:[%s3948_s1 + $0xa0] ss:$8 sps:$4 sm:$0xff]   ;;  %v179_v55 = vld [vmem:[%s3052_s24 + $0x70] sm:$0xff]  ;;  %v2694_v58 = vld [vmem:[%s3948_s1 + $0x84] ss:$8 sps:$4 sm:$0xff]  }
  0x45   : > { %606 = vmatpush1.bf16.msra.mxu0 %v2639_v14  ;;  %v182_v56 = vld [vmem:[%s3052_s24 + $0x88] sm:$0xff]  ;;  %v2693_v57 = vld [vmem:[%s3948_s1 + $0x90] ss:$8 sps:$4 sm:$0xff]   ;;  %v165_v61 = vld [vmem:[%s3052_s24] sm:$0xff] }
  0x46   : > { %607 = vmatprep.subr.bf16.mxu0 %v2640_v16  ;;  %v269_v59 = vpack.c.bf16 %v182_v56, %v179_v55  ;;  %v2696_v60 = vld [vmem:[%s3948_s1 + $0x80] ss:$8 sps:$4 sm:$0xff]   ;;  %v168_v62 = vld [vmem:[%s3052_s24 + $0x18] sm:$0xff]  ;;  %v175_v1 = vld [vmem:[%s3052_s24 + $0x50] sm:$0xff] }
  0x47   : > { %799 = vmatpush1.bf16.msra.mxu1 %v2672_v25  ;;  %v172_v63 = vld [vmem:[%s3052_s24 + $0x38] sm:$0xff]  ;;  %v185_v2 = vld [vmem:[%s3052_s24 + $0xa0] sm:$0xff]  ;;  %v261_v4 = vpack.c.bf16 %v168_v62, %v165_v61  ;;  %v171_v7 = vld [vmem:[%s3052_s24 + $0x30] sm:$0xff] }
  0x48   : > { %800 = vmatprep.subr.bf16.mxu1 %v2676_v26  ;;  %v188_v3 = vld [vmem:[%s3052_s24 + $0xb8] sm:$0xff]  ;;  %v265_v5 = vpack.c.bf16 %v175_v1, %v172_v63  ;;  %v174_v8 = vld [vmem:[%s3052_s24 + $0x48] sm:$0xff]  ;;  %v181_v10 = vld [vmem:[%s3052_s24 + $0x80] sm:$0xff] }
  0x49   : > { %608 = vmatpush1.bf16.msra.mxu0 %v2642_v19  ;;  %v272_v6 = vpack.c.bf16 %v188_v3, %v185_v2  ;;  %v178_v9 = vld [vmem:[%s3052_s24 + $0x68] sm:$0xff]  ;;  %v191_v11 = vld [vmem:[%s3052_s24 + $0xd0] sm:$0xff]  ;;  %v264_v13 = vpack.c.bf16 %v174_v8, %v171_v7  ;;  %v177_v16 = vld [vmem:[%s3052_s24 + $0x60] sm:$0xff] }
  0x4a   : > { %609 = vmatprep.subr.bf16.mxu0 %v2643_v20  ;;  %v194_v12 = vld [vmem:[%s3052_s24 + $0xe8] sm:$0xff]  ;;  %v268_v14 = vpack.c.bf16 %v181_v10, %v178_v9  ;;  %v180_v17 = vld [vmem:[%s3052_s24 + $0x78] sm:$0xff]  ;;  %v187_v19 = vld [vmem:[%s3052_s24 + $0xb0] sm:$0xff] }
  0x4b   : > { %801 = vmatpush1.bf16.msra.mxu1 %v2678_v29  ;;  %v275_v15 = vpack.c.bf16 %v194_v12, %v191_v11  ;;  %v184_v18 = vld [vmem:[%s3052_s24 + $0x98] sm:$0xff]  ;;  %v197_v20 = vld [vmem:[%s3052_s24 + $0x100] sm:$0xff]  ;;  %v267_v22 = vpack.c.bf16 %v180_v17, %v177_v16  ;;  %v183_v25 = vld [vmem:[%s3052_s24 + $0x90] sm:$0xff] }
  0x4c   : > { %802 = vmatprep.subr.bf16.mxu1 %v2682_v30  ;;  %v200_v21 = vld [vmem:[%s3052_s24 + $0x118] sm:$0xff]  ;;  %v186_v26 = vld [vmem:[%s3052_s24 + $0xa8] sm:$0xff]  ;;  %v203_v29 = vld [vmem:[%s3052_s24 + $0x130] sm:$0xff] }
  0x4d   : > { %610 = vmatpush1.bf16.msra.mxu0 %v2645_v23  ;;  %v271_v23 = vpack.c.bf16 %v187_v19, %v184_v18  ;;  %v206_v30 = vld [vmem:[%s3052_s24 + $0x148] sm:$0xff]  ;;  %v192_v35 = vld [vmem:[%s3052_s24 + $0xd8] sm:$0xff]  ;;  %v199_v37 = vld [vmem:[%s3052_s24 + $0x110] sm:$0xff] }
  0x4e   : > { %611 = vmatprep.subr.bf16.mxu0 %v2649_v24  ;;  %v278_v24 = vpack.c.bf16 %v200_v21, %v197_v20  ;;  %v281_v33 = vpack.c.bf16 %v206_v30, %v203_v29  ;;  %v218_v48 = vld [vmem:[%s3052_s24 + $0x1a8] sm:$0xff]  ;;  %v211_v55 = vld [vmem:[%s3052_s24 + $0x170] sm:$0xff]  ;;  %v221_v56 = vld [vmem:[%s3052_s24 + $0x1c0] sm:$0xff] }
  0x4f   : > { %803 = vmatpush1.bf16.msra.mxu1 %v2684_v34  ;;  %v189_v34 = vld [vmem:[%s3052_s24 + $0xc0] sm:$0xff]  ;;  %v207_v61 = vld [vmem:[%s3052_s24 + $0x150] sm:$0xff]  ;;  %v210_v62 = vld [vmem:[%s3052_s24 + $0x168] sm:$0xff] }
  0x50   : > { %804 = vmatprep.subr.bf16.mxu1 %v2688_v36  ;;  %v196_v36 = vld [vmem:[%s3052_s24 + $0xf8] sm:$0xff]  ;;  %v214_v63 = vld [vmem:[%s3052_s24 + $0x188] sm:$0xff]  ;;  %v217_v1 = vld [vmem:[%s3052_s24 + $0x1a0] sm:$0xff] }
  0x51   : > { %612 = vmatpush1.bf16.msra.mxu0 %v2651_v27  ;;  %v190_v27 = vld [vmem:[%s3052_s24 + $0xc8] sm:$0xff]  ;;  %v277_v41 = vpack.c.bf16 %v199_v37, %v196_v36  ;;  %v227_v2 = vld [vmem:[%s3052_s24 + $0x1f0] sm:$0xff]  ;;  %v213_v7 = vld [vmem:[%s3052_s24 + $0x180] sm:$0xff] }
  0x52   : > { %613 = vmatprep.subr.bf16.mxu0 %v2655_v28  ;;  %v193_v28 = vld [vmem:[%s3052_s24 + $0xe0] sm:$0xff]  ;;  %v230_v3 = vld [vmem:[%s3052_s24 + $0x208] sm:$0xff]  ;;  %v216_v8 = vld [vmem:[%s3052_s24 + $0x198] sm:$0xff] }
  0x53   : > { %805 = vmatpush1.bf16.msra.mxu1 %v2690_v40  ;;  %v273_v40 = vpack.c.bf16 %v192_v35, %v189_v34  ;;  %v220_v9 = vld [vmem:[%s3052_s24 + $0x1b8] sm:$0xff]  ;;  %v223_v10 = vld [vmem:[%s3052_s24 + $0x1d0] sm:$0xff]  ;;  %v233_v11 = vld [vmem:[%s3052_s24 + $0x220] sm:$0xff] }
  0x54   : > { %v236_v12 = vld [vmem:[%s3052_s24 + $0x238] sm:$0xff]  ;;  %v219_v16 = vld [vmem:[%s3052_s24 + $0x1b0] sm:$0xff]  ;;  %v222_v17 = vld [vmem:[%s3052_s24 + $0x1c8] sm:$0xff] }
  0x55   : > { %614 = vmatpush2.bf16.msra.mxu0 %v2657_v31  ;;  %v270_v31 = vpack.c.bf16 %v186_v26, %v183_v25  ;;  %v226_v18 = vld [vmem:[%s3052_s24 + $0x1e8] sm:$0xff]  ;;  %v229_v19 = vld [vmem:[%s3052_s24 + $0x200] sm:$0xff]  ;;  %v239_v20 = vld [vmem:[%s3052_s24 + $0x250] sm:$0xff] }
  0x56   : > { %615 = vmatprep.subr.bf16.mxu0 %v2661_v32  ;;  %823 = vmatmul.mubr.bf16.vlgmr.msra.gmra.mxu1 %v263_v45  ;;  %v274_v32 = vpack.c.bf16 %v193_v28, %v190_v27  ;;  %v202_v45 = vld [vmem:[%s3052_s24 + $0x128] sm:$0xff]  ;;  %v225_v25 = vld [vmem:[%s3052_s24 + $0x1e0] sm:$0xff]  ;;  %v228_v26 = vld [vmem:[%s3052_s24 + $0x1f8] sm:$0xff] }
  0x57   : > { %832 = vmatprep.mubr.bf16.mxu1 %v2956_v0  ;;  %v242_v21 = vld [vmem:[%s3052_s24 + $0x268] sm:$0xff]  ;;  %v232_v27 = vld [vmem:[%s3052_s24 + $0x218] sm:$0xff]  ;;  %v235_v28 = vld [vmem:[%s3052_s24 + $0x230] sm:$0xff] }
  0x58   : > { %v245_v29 = vld [vmem:[%s3052_s24 + $0x280] sm:$0xff]  ;;  %v248_v30 = vld [vmem:[%s3052_s24 + $0x298] sm:$0xff]  ;;  %v231_v34 = vld [vmem:[%s3052_s24 + $0x210] sm:$0xff] }
  0x59   : > { %616 = vmatpush2.bf16.msra.mxu0 %v2663_v38  ;;  %v209_v38 = vld [vmem:[%s3052_s24 + $0x160] sm:$0xff]  ;;  %v234_v35 = vld [vmem:[%s3052_s24 + $0x228] sm:$0xff] }
  0x5a   : > { %617 = vmatprep.subr.bf16.mxu0 %v2667_v39  ;;  %v212_v39 = vld [vmem:[%s3052_s24 + $0x178] sm:$0xff]  ;;  %v238_v36 = vld [vmem:[%s3052_s24 + $0x248] sm:$0xff]  ;;  %v241_v37 = vld [vmem:[%s3052_s24 + $0x260] sm:$0xff] }
  0x5b   : > { %v284_v42 = vpack.c.bf16 %v212_v39, %v209_v38  ;;  %v251_v38 = vld [vmem:[%s3052_s24 + $0x2b0] sm:$0xff]  ;;  %v254_v39 = vld [vmem:[%s3052_s24 + $0x2c8] sm:$0xff] }
  0x5d   : > { %618 = vmatpush2.bf16.msra.mxu0 %v2669_v43  ;;  %v195_v43 = vld [vmem:[%s3052_s24 + $0xf0] sm:$0xff] }
  0x5e   : > { %619 = vmatprep.subr.bf16.mxu0 %v2673_v44  ;;  %833 = vmatmul.mubr.bf16.gmra.mxu1 %v266_v52  ;;  %v198_v44 = vld [vmem:[%s3052_s24 + $0x108] sm:$0xff]  ;;  %v201_v52 = vld [vmem:[%s3052_s24 + $0x120] sm:$0xff] }
  0x5f   : > { %842 = vmatprep.mubr.bf16.mxu1 %v2956_v0  ;;  %v276_v49 = vpack.c.bf16 %v198_v44, %v195_v43  ;;  %v237_v43 = vld [vmem:[%s3052_s24 + $0x240] sm:$0xff]  ;;  %v240_v44 = vld [vmem:[%s3052_s24 + $0x258] sm:$0xff] }
  0x61   : > { %620 = vmatpush2.bf16.msra.mxu0 %v2675_v46  ;;  %v205_v46 = vld [vmem:[%s3052_s24 + $0x140] sm:$0xff] }
  0x62   : > { %621 = vmatprep.subr.bf16.mxu0 %v2679_v47  ;;  %v215_v47 = vld [vmem:[%s3052_s24 + $0x190] sm:$0xff] }
  0x65   : > { %622 = vmatpush2.bf16.msra.mxu0 %v2681_v50  ;;  %v280_v50 = vpack.c.bf16 %v205_v46, %v202_v45  ;;  %v244_v45 = vld [vmem:[%s3052_s24 + $0x278] sm:$0xff]  ;;  %v247_v46 = vld [vmem:[%s3052_s24 + $0x290] sm:$0xff] }
  0x66   : > { %623 = vmatprep.subr.bf16.mxu0 %v2685_v51  ;;  %843 = vmatmul.mubr.bf16.gmra.mxu1 %v269_v59  ;;  %v287_v51 = vpack.c.bf16 %v218_v48, %v215_v47  ;;  %v257_v47 = vld [vmem:[%s3052_s24 + $0x2e0] sm:$0xff]  ;;  %v260_v48 = vld [vmem:[%s3052_s24 + $0x2f8] sm:$0xff] }
  0x67   : > { %852 = vmatprep.mubr.bf16.mxu1 %v2956_v0 }
  0x69   : > { %624 = vmatpush2.bf16.msra.mxu0 %v2687_v53  ;;  %v204_v53 = vld [vmem:[%s3052_s24 + $0x138] sm:$0xff] }
  0x6a   : > { %625 = vmatprep.subr.bf16.mxu0 %v2691_v54  ;;  %v208_v54 = vld [vmem:[%s3052_s24 + $0x158] sm:$0xff] }
  0x6b   : > { %v283_v59 = vpack.c.bf16 %v211_v55, %v208_v54  ;;  %v250_v54 = vld [vmem:[%s3052_s24 + $0x2a8] sm:$0xff]  ;;  %v253_v55 = vld [vmem:[%s3052_s24 + $0x2c0] sm:$0xff] }
  0x6d   : > { %626 = vmatpush2.bf16.msra.mxu0 %v2693_v57  ;;  %v224_v57 = vld [vmem:[%s3052_s24 + $0x1d8] sm:$0xff] }
  0x6e   : > { %627 = vmatprep.subr.bf16.mxu0 %v2694_v58  ;;  %853 = vmatmul.mubr.bf16.gmra.mxu1 %v272_v6  ;;  %v279_v58 = vpack.c.bf16 %v204_v53, %v201_v52  ;;  %v293_v6 = vpack.c.bf16 %v230_v3, %v227_v2  ;;  %v243_v52 = vld [vmem:[%s3052_s24 + $0x270] sm:$0xff]  ;;  %v246_v53 = vld [vmem:[%s3052_s24 + $0x288] sm:$0xff] }
  0x6f   : > { %862 = vmatprep.mubr.bf16.mxu1 %v2956_v0 }
  0x71   : > { %628 = vmatpush2.bf16.msra.mxu0 %v2696_v60  ;;  %v290_v60 = vpack.c.bf16 %v224_v57, %v221_v56  ;;  %v300_v56 = vpack.c.bf16 %v246_v53, %v243_v52  ;;  %v249_v57 = vld [vmem:[%s3052_s24 + $0x2a0] sm:$0xff] }
  0x74   : > { %630 = vmatmul.mubr.bf16.vlgmr.msra.gmra.mxu0 %v261_v4  ;;  %v282_v4 = vpack.c.bf16 %v210_v62, %v207_v61 }
  0x75   : > { %639 = vmatprep.mubr.bf16.mxu0 %v265_v5  ;;  %v286_v5 = vpack.c.bf16 %v217_v1, %v214_v63  ;;  %v255_v63 = vld [vmem:[%s3052_s24 + $0x2d0] sm:$0xff]  ;;  %v258_v1 = vld [vmem:[%s3052_s24 + $0x2e8] sm:$0xff] }
  0x76   : > { %863 = vmatmul.mubr.bf16.gmra.mxu1 %v275_v15  ;;  %v296_v15 = vpack.c.bf16 %v236_v12, %v233_v11  ;;  %v306_v2 = vpack.c.bf16 %v258_v1, %v255_v63 }
  0x77   : > { %872 = vmatprep.mubr.bf16.mxu1 %v2956_v0 }
  0x7c   : > { %640 = vmatmul.mubr.bf16.gmra.mxu0 %v264_v13  ;;  %v285_v13 = vpack.c.bf16 %v216_v8, %v213_v7 }
  0x7d   : > { %649 = vmatprep.mubr.bf16.mxu0 %v268_v14  ;;  %v289_v14 = vpack.c.bf16 %v223_v10, %v220_v9 }
  0x7e   : > { %873 = vmatmul.mubr.bf16.gmra.mxu1 %v278_v24  ;;  %v299_v24 = vpack.c.bf16 %v242_v21, %v239_v20 }
  0x7f   : > { %882 = vmatprep.mubr.bf16.mxu1 %v2956_v0 }
  0x84   : > { %650 = vmatmul.mubr.bf16.gmra.mxu0 %v267_v22  ;;  %v288_v22 = vpack.c.bf16 %v222_v17, %v219_v16 }
  0x85   : > { %659 = vmatprep.mubr.bf16.mxu0 %v271_v23  ;;  %v292_v23 = vpack.c.bf16 %v229_v19, %v226_v18 }
  0x86   : > { %883 = vmatmul.mubr.bf16.gmra.mxu1 %v281_v33  ;;  %v302_v33 = vpack.c.bf16 %v248_v30, %v245_v29 }
  0x87   : > { %892 = vmatprep.mubr.bf16.mxu1 %v2956_v0 }
  0x8c   : > { %660 = vmatmul.mubr.bf16.gmra.mxu0 %v270_v31  ;;  %v291_v31 = vpack.c.bf16 %v228_v26, %v225_v25 }
  0x8d   : > { %669 = vmatprep.mubr.bf16.mxu0 %v274_v32  ;;  %v295_v32 = vpack.c.bf16 %v235_v28, %v232_v27 }
  0x8e   : > { %893 = vmatmul.mubr.bf16.gmra.mxu1 %v284_v42  ;;  %v305_v42 = vpack.c.bf16 %v254_v39, %v251_v38 }
  0x8f   : > { %902 = vmatprep.mubr.bf16.mxu1 %v2956_v0 }
  0x94   : > { %670 = vmatmul.mubr.bf16.gmra.mxu0 %v273_v40  ;;  %v294_v40 = vpack.c.bf16 %v234_v35, %v231_v34 }
  0x95   : > { %679 = vmatprep.mubr.bf16.mxu0 %v277_v41  ;;  %v298_v41 = vpack.c.bf16 %v241_v37, %v238_v36 }
  0x96   : > { %903 = vmatmul.mubr.bf16.gmra.mxu1 %v287_v51  ;;  %v308_v51 = vpack.c.bf16 %v260_v48, %v257_v47 }
  0x97   : > { %912 = vmatprep.mubr.bf16.mxu1 %v2956_v0 }
  0x9c   : > { %680 = vmatmul.mubr.bf16.gmra.mxu0 %v276_v49  ;;  %v297_v49 = vpack.c.bf16 %v240_v44, %v237_v43 }
  0x9d   : > { %689 = vmatprep.mubr.bf16.mxu0 %v280_v50  ;;  %v301_v50 = vpack.c.bf16 %v247_v46, %v244_v45 }
  0x9e   : > { %913 = vmatmul.mubr.bf16.gmra.mxu1 %v290_v60  ;;  %v259_v60 = vld [vmem:[%s3052_s24 + $0x2f0] sm:$0xff] }
  0x9f   : > { %922 = vmatprep.mubr.bf16.mxu1 %v2956_v0 }
  0xa4   : > { %690 = vmatmul.mubr.bf16.gmra.mxu0 %v279_v58  ;;  %v252_v58 = vld [vmem:[%s3052_s24 + $0x2b8] sm:$0xff] }
  0xa5   : > { %699 = vmatprep.mubr.bf16.mxu0 %v283_v59  ;;  %v256_v59 = vld [vmem:[%s3052_s24 + $0x2d8] sm:$0xff]  ;;  %v303_v61 = vpack.c.bf16 %v252_v58, %v249_v57  ;;  %s2957_s24 = smov 64  }
  0xa6   : > { %923 = vmatmul.mubr.bf16.gmra.mxu1 %v293_v6  ;;  %v307_v62 = vpack.c.bf16 %v259_v60, %v256_v59 }
  0xa7   : > { %932 = vmatprep.mubr.bf16.mxu1 %v2956_v0 }
  0xac   : > { %700 = vmatmul.mubr.bf16.gmra.mxu0 %v282_v4 }
  0xad   : > { %709 = vmatprep.mubr.bf16.mxu0 %v286_v5 }
  0xae   : > { %933 = vmatmul.mubr.bf16.gmra.mxu1 %v296_v15 }
  0xaf   : > { %942 = vmatprep.mubr.bf16.mxu1 %v2956_v0 }
  0xb4   : > { %710 = vmatmul.mubr.bf16.gmra.mxu0 %v285_v13 }
  0xb5   : > { %719 = vmatprep.mubr.bf16.mxu0 %v289_v14 }
  0xb6   : > { %943 = vmatmul.mubr.bf16.gmra.mxu1 %v299_v24 }
  0xb7   : > { %952 = vmatprep.mubr.bf16.mxu1 %v2956_v0 }
  0xbc   : > { %720 = vmatmul.mubr.bf16.gmra.mxu0 %v288_v22 }
  0xbd   : > { %729 = vmatprep.mubr.bf16.mxu0 %v292_v23 }
  0xbe   : > { %953 = vmatmul.mubr.bf16.gmra.mxu1 %v302_v33 }
  0xbf   : > { %962 = vmatprep.mubr.bf16.mxu1 %v2956_v0 }
  0xc4   : > { %730 = vmatmul.mubr.bf16.gmra.mxu0 %v291_v31 }
  0xc5   : > { %739 = vmatprep.mubr.bf16.mxu0 %v295_v32 }
  0xc6   : > { %963 = vmatmul.mubr.bf16.gmra.mxu1 %v305_v42 }
  0xc7   : > { %972 = vmatprep.mubr.bf16.mxu1 %v2956_v0  ;;  %v304_v0 = vpack.c.bf16 %v253_v55, %v250_v54 }
  0xcc   : > { %740 = vmatmul.mubr.bf16.gmra.mxu0 %v294_v40 }
  0xcd   : > { %749 = vmatprep.mubr.bf16.mxu0 %v298_v41 }
  0xce   : > { %973 = vmatmul.mubr.bf16.gmra.mxu1 %v308_v51 }
  0xd4   : > { %750 = vmatmul.mubr.bf16.gmra.mxu0 %v297_v49 }
  0xd5   : > { %759 = vmatprep.mubr.bf16.mxu0 %v301_v50 }
  0xdc   : > { %760 = vmatmul.mubr.bf16.gmra.mxu0 %v300_v56 }
  0xdd   : > { %769 = vmatprep.mubr.bf16.mxu0 %v304_v0 }
  0xe4   : > { %770 = vmatmul.mubr.bf16.gmra.mxu0 %v303_v61 }
  0xe5   : > { %779 = vmatprep.mubr.bf16.mxu0 %v307_v62 }
  0xec   : > { %780 = vmatmul.mubr.bf16.gmra.mxu0 %v306_v2 }
 0x116   : > { %v824_v3 = vpop.f32.mrf.mxu1 }
 0x118   : > { %v826_v4 = vpop.f32.mrf.mxu1 }
 0x11a   : > { %v828_v5 = vpop.f32.mrf.mxu1 }
 0x11c   : > { %v3314_v6 = vpop.f32.mrf.mxu1 }
 0x11d   : > { %3968 = vst [vmem:[#allocation5_spill] sm:$0xff] %v3314_v6 }
 0x11e   : > { %v834_v7 = vpop.f32.mrf.mxu1 }
 0x120   : > { %v836_v8 = vpop.f32.mrf.mxu1 }
 0x122   : > { %v838_v9 = vpop.f32.mrf.mxu1 }
 0x124   : > { %v3316_v10 = vpop.f32.mrf.mxu1 }
 0x125   : > { %3969 = vst [vmem:[#allocation6_spill] sm:$0xff] %v3316_v10 }
 0x126   : > { %v844_v11 = vpop.f32.mrf.mxu1 }
 0x128   : > { %v846_v12 = vpop.f32.mrf.mxu1 }
 0x12a   : > { %v848_v13 = vpop.f32.mrf.mxu1 }
 0x12c   : > { %v850_v15 = vpop.f32.mrf.mxu1 }
 0x12e   : > { %v854_v17 = vpop.f32.mrf.mxu1 }
 0x130   : > { %v856_v20 = vpop.f32.mrf.mxu1 }
 0x132   : > { %v858_v24 = vpop.f32.mrf.mxu1 }
 0x134   : > { %v631_v14 = vpop.f32.mrf.mxu0  ;;  %v860_v27 = vpop.f32.mrf.mxu1 }
 0x135   : > { %v825_v21 = vadd.f32 %v824_v3, %v631_v14 }
 0x136   : > { %v633_v16 = vpop.f32.mrf.mxu0  ;;  %v864_v30 = vpop.f32.mrf.mxu1 }
 0x137   : > { %v3318_v18 = vadd.f32 %v826_v4, %v633_v16 }
 0x138   : > { %v635_v19 = vpop.f32.mrf.mxu0  ;;  %v866_v33 = vpop.f32.mrf.mxu1 }
 0x139   : > { %3970 = vst [vmem:[#allocation7_spill] sm:$0xff] %v3318_v18  ;;  %v829_v22 = vadd.f32 %v828_v5, %v635_v19 }
 0x13a   : > { %v3320_v23 = vpop.f32.mrf.mxu0  ;;  %v868_v36 = vpop.f32.mrf.mxu1 }
 0x13b   : > { %3971 = vst [vmem:[#allocation8_spill] sm:$0xff] %v3320_v23  ;;  %v3322_v25 = vpack.c.bf16 %v829_v22, %v825_v21 }
 0x13c   : > { %v641_v26 = vpop.f32.mrf.mxu0  ;;  %v870_v39 = vpop.f32.mrf.mxu1 }
 0x13d   : > { %3972 = vst [vmem:[#allocation9_spill] sm:$0xff] %v3322_v25  ;;  %v835_v28 = vadd.f32 %v834_v7, %v641_v26  ;;  %2411 = vmatprep.mubr.msk.bf16.mxu1 %vm1047_vm0, %v3322_v25 }
 0x13e   : > { %v643_v29 = vpop.f32.mrf.mxu0  ;;  %v874_v42 = vpop.f32.mrf.mxu1 }
 0x13f   : > { %v3326_v31 = vadd.f32 %v836_v8, %v643_v29 }
 0x140   : > { %v645_v32 = vpop.f32.mrf.mxu0  ;;  %v876_v45 = vpop.f32.mrf.mxu1 }
 0x141   : > { %3973 = vst [vmem:[#allocation10_spill] sm:$0xff] %v3326_v31  ;;  %v839_v34 = vadd.f32 %v838_v9, %v645_v32 }
 0x142   : > { %v3328_v35 = vpop.f32.mrf.mxu0  ;;  %v878_v48 = vpop.f32.mrf.mxu1 }
 0x143   : > { %3974 = vst [vmem:[#allocation11_spill] sm:$0xff] %v3328_v35  ;;  %v3330_v37 = vpack.c.bf16 %v839_v34, %v835_v28 }
 0x144   : > { %v651_v38 = vpop.f32.mrf.mxu0  ;;  %v880_v52 = vpop.f32.mrf.mxu1 }
 0x145   : > { %3975 = vst [vmem:[#allocation12_spill] sm:$0xff] %v3330_v37  ;;  %v845_v40 = vadd.f32 %v844_v11, %v651_v38 }
 0x146   : > { %v653_v41 = vpop.f32.mrf.mxu0  ;;  %v884_v56 = vpop.f32.mrf.mxu1 }
 0x147   : > { %v847_v43 = vadd.f32 %v846_v12, %v653_v41 }
 0x148   : > { %v655_v44 = vpop.f32.mrf.mxu0  ;;  %v886_v58 = vpop.f32.mrf.mxu1 }
 0x149   : > { %v849_v46 = vadd.f32 %v848_v13, %v655_v44 }
 0x14a   : > { %v657_v47 = vpop.f32.mrf.mxu0  ;;  %v888_v61 = vpop.f32.mrf.mxu1 }
 0x14b   : > { %v3332_v49 = vpack.c.bf16 %v849_v46, %v845_v40  ;;  %v851_v50 = vadd.f32 %v850_v15, %v657_v47 }
 0x14c   : > { %v661_v51 = vpop.f32.mrf.mxu0  ;;  %v890_v2 = vpop.f32.mrf.mxu1 }
 0x14d   : > { %3976 = vst [vmem:[#allocation13_spill] sm:$0xff] %v3332_v49  ;;  %v3334_v53 = vpack.c.bf16 %v851_v50, %v847_v43  ;;  %v855_v54 = vadd.f32 %v854_v17, %v661_v51 }
 0x14e   : > { %v663_v55 = vpop.f32.mrf.mxu0  ;;  %v894_v7 = vpop.f32.mrf.mxu1 }
 0x14f   : > { %3977 = vst [vmem:[#allocation14_spill] sm:$0xff] %v3334_v53  ;;  %v857_v0 = vadd.f32 %v856_v20, %v663_v55 }
 0x150   : > { %v665_v57 = vpop.f32.mrf.mxu0  ;;  %v896_v11 = vpop.f32.mrf.mxu1 }
 0x151   : > { %v859_v59 = vadd.f32 %v858_v24, %v665_v57 }
 0x152   : > { %v667_v60 = vpop.f32.mrf.mxu0  ;;  %v898_v14 = vpop.f32.mrf.mxu1 }
 0x153   : > { %v3336_v62 = vpack.c.bf16 %v859_v59, %v855_v54  ;;  %v861_v63 = vadd.f32 %v860_v27, %v667_v60 }
 0x154   : > { %v671_v1 = vpop.f32.mrf.mxu0  ;;  %v900_v19 = vpop.f32.mrf.mxu1 }
 0x155   : > { %v3338_v3 = vpack.c.bf16 %v861_v63, %v857_v0  ;;  %v865_v4 = vadd.f32 %v864_v30, %v671_v1 }
 0x156   : > { %v673_v5 = vpop.f32.mrf.mxu0  ;;  %v904_v24 = vpop.f32.mrf.mxu1 }
 0x157   : > { %3978 = vst [vmem:[#allocation15_spill] sm:$0xff] %v3338_v3  ;;  %v867_v8 = vadd.f32 %v866_v33, %v673_v5 }
 0x158   : > { %v675_v9 = vpop.f32.mrf.mxu0  ;;  %v906_v28 = vpop.f32.mrf.mxu1 }
 0x159   : > { %v869_v12 = vadd.f32 %v868_v36, %v675_v9 }
 0x15a   : > { %v677_v13 = vpop.f32.mrf.mxu0  ;;  %v908_v32 = vpop.f32.mrf.mxu1 }
 0x15b   : > { %v3340_v15 = vpack.c.bf16 %v869_v12, %v865_v4  ;;  %v871_v16 = vadd.f32 %v870_v39, %v677_v13 }
 0x15c   : > { %v681_v17 = vpop.f32.mrf.mxu0  ;;  %v910_v38 = vpop.f32.mrf.mxu1 }
 0x15d   : > { %v3342_v20 = vpack.c.bf16 %v871_v16, %v867_v8  ;;  %v875_v21 = vadd.f32 %v874_v42, %v681_v17 }
 0x15e   : > { %v683_v22 = vpop.f32.mrf.mxu0  ;;  %v914_v41 = vpop.f32.mrf.mxu1 }
 0x15f   : > { %v877_v26 = vadd.f32 %v876_v45, %v683_v22 }
 0x160   : > { %v685_v27 = vpop.f32.mrf.mxu0  ;;  %v916_v42 = vpop.f32.mrf.mxu1 }
 0x161   : > { %v879_v29 = vadd.f32 %v878_v48, %v685_v27 }
 0x162   : > { %v687_v30 = vpop.f32.mrf.mxu0  ;;  %v3348_v50 = vpop.f32.mrf.mxu1 }
 0x163   : > { %v3344_v33 = vpack.c.bf16 %v879_v29, %v875_v21  ;;  %v881_v34 = vadd.f32 %v880_v52, %v687_v30 }
 0x164   : > { %v691_v36 = vpop.f32.mrf.mxu0  ;;  %v920_v55 = vpop.f32.mrf.mxu1 }
 0x165   : > { %v3346_v40 = vpack.c.bf16 %v881_v34, %v877_v26  ;;  %v885_v46 = vadd.f32 %v884_v56, %v691_v36 }
 0x166   : > { %v693_v39 = vpop.f32.mrf.mxu0  ;;  %v3356_v57 = vpop.f32.mrf.mxu1 }
 0x167   : > { %v887_v43 = vadd.f32 %v886_v58, %v693_v39 }
 0x168   : > { %v695_v44 = vpop.f32.mrf.mxu0  ;;  %v3358_v59 = vpop.f32.mrf.mxu1 }
 0x169   : > { %v889_v47 = vadd.f32 %v888_v61, %v695_v44  ;;  %3980 = vst [vmem:[#allocation17_spill] sm:$0xff] %v3358_v59 }
 0x16a   : > { %v697_v45 = vpop.f32.mrf.mxu0  ;;  %v3360_v1 = vpop.f32.mrf.mxu1 }
 0x16b   : > { %v3350_v48 = vpack.c.bf16 %v889_v47, %v885_v46  ;;  %v891_v51 = vadd.f32 %v890_v2, %v697_v45 }
 0x16c   : > { %v701_v54 = vpop.f32.mrf.mxu0  ;;  %v3364_v8 = vpop.f32.mrf.mxu1 }
 0x16d   : > { %3979 = vst [vmem:[#allocation16_spill] sm:$0xff] %v3350_v48  ;;  %v3352_v52 = vpack.c.bf16 %v891_v51, %v887_v43  ;;  %1027 = vrot.lane.b32.xlu1 %v3350_v48, %s2957_s24  ;;  %v895_v60 = vadd.f32 %v894_v7, %v701_v54 }
 0x16e   : > { %v703_v0 = vpop.f32.mrf.mxu0  ;;  %v3370_v13 = vpop.f32.mrf.mxu1 }
 0x16f   : > { %v897_v58 = vadd.f32 %v896_v11, %v703_v0 }
 0x170   : > { %v705_v56 = vpop.f32.mrf.mxu0  ;;  %v3372_v16 = vpop.f32.mrf.mxu1 }
 0x171   : > { %v899_v61 = vadd.f32 %v898_v14, %v705_v56 }
 0x172   : > { %v707_v63 = vpop.f32.mrf.mxu0  ;;  %v3374_v22 = vpop.f32.mrf.mxu1 }
 0x173   : > { %v3362_v2 = vpack.c.bf16 %v899_v61, %v895_v60  ;;  %v901_v4 = vadd.f32 %v900_v19, %v707_v63 }
 0x174   : > { %v711_v5 = vpop.f32.mrf.mxu0  ;;  %v3378_v29 = vpop.f32.mrf.mxu1 }
 0x175   : > { %3981 = vst [vmem:[#allocation18_spill] sm:$0xff] %v3362_v2  ;;  %v3366_v9 = vpack.c.bf16 %v901_v4, %v897_v58  ;;  %v905_v12 = vadd.f32 %v904_v24, %v711_v5  ;;  %1029 = vrot.lane.b32.xlu0 %v3362_v2, %s2957_s24 }
 0x176   : > { %v713_v11 = vpop.f32.mrf.mxu0  ;;  %v944_v36 = vpop.f32.mrf.mxu1 }
 0x177   : > { %v907_v7 = vadd.f32 %v906_v28, %v713_v11 }
 0x178   : > { %v715_v14 = vpop.f32.mrf.mxu0  ;;  %v3386_v43 = vpop.f32.mrf.mxu1 }
 0x179   : > { %v909_v17 = vadd.f32 %v908_v32, %v715_v14 }
 0x17a   : > { %v717_v21 = vpop.f32.mrf.mxu0  ;;  %v948_v44 = vpop.f32.mrf.mxu1 }
 0x17b   : > { %v3376_v19 = vpack.c.bf16 %v909_v17, %v905_v12  ;;  %v911_v26 = vadd.f32 %v910_v38, %v717_v21 }
 0x17c   : > { %v721_v27 = vpop.f32.mrf.mxu0  ;;  %v3390_v38 = vpop.f32.mrf.mxu1 }
 0x17d   : > { %3982 = vst [vmem:[#allocation19_spill] sm:$0xff] %v3376_v19  ;;  %v3380_v24 = vpack.c.bf16 %v911_v26, %v907_v7  ;;  %v3382_v30 = vadd.f32 %v914_v41, %v721_v27 }
 0x17e   : > { %v723_v34 = vpop.f32.mrf.mxu0  ;;  %v954_v41 = vpop.f32.mrf.mxu1 }
 0x17f   : > { %3983 = vst [vmem:[#allocation20_spill] sm:$0xff] %v3380_v24  ;;  %v917_v28 = vadd.f32 %v916_v42, %v723_v34 }
 0x180   : > { %v3384_v39 = vpop.f32.mrf.mxu0  ;;  %v3398_v42 = vpop.f32.mrf.mxu1 }
 0x182   : > { %v727_v32 = vpop.f32.mrf.mxu0  ;;  %v958_v60 = vpop.f32.mrf.mxu1 }
 0x183   : > { %v921_v46 = vadd.f32 %v920_v55, %v727_v32 }
 0x184   : > { %v3388_v47 = vpop.f32.mrf.mxu0  ;;  %v960_v63 = vpop.f32.mrf.mxu1 }
 0x185   : > { %v3392_v45 = vpack.c.bf16 %v921_v46, %v917_v28 }
 0x186   : > { %v3394_v51 = vpop.f32.mrf.mxu0  ;;  %v964_v12 = vpop.f32.mrf.mxu1 }
 0x187   : > { %3984 = vst [vmem:[#allocation21_spill] sm:$0xff] %v3392_v45 }
 0x188   : > { %v735_v54 = vpop.f32.mrf.mxu0  ;;  %v966_v14 = vpop.f32.mrf.mxu1 }
 0x18a   : > { %v3396_v0 = vpop.f32.mrf.mxu0  ;;  %v968_v26 = vpop.f32.mrf.mxu1 }
 0x18c   : > { %v741_v58 = vpop.f32.mrf.mxu0  ;;  %v970_v28 = vpop.f32.mrf.mxu1 }
 0x18e   : > { %v3400_v56 = vpop.f32.mrf.mxu0  ;;  %v974_v2 = vpop.f32.mrf.mxu1 }
 0x190   : > { %v745_v61 = vpop.f32.mrf.mxu0  ;;  %v976_v31 = vpop.f32.mrf.mxu1 }
 0x192   : > { %v3402_v55 = vpop.f32.mrf.mxu0  ;;  %v978_v10 = vpop.f32.mrf.mxu1 }
 0x194   : > { %v751_v4 = vpop.f32.mrf.mxu0 }
 0x195   : > { %v945_v19 = vadd.f32 %v944_v36, %v751_v4  ;;  %v937_v36 = vadd.f32 %v3372_v16, %v3400_v56  ;;  %v3993_v56 = vld [vmem:[#allocation9_spill] sm:$0xff] }
 0x196   : > { %v3404_v5 = vpop.f32.mrf.mxu0 }
 0x198   : > { %v755_v11 = vpop.f32.mrf.mxu0 }
 0x199   : > { %v949_v37 = vadd.f32 %v948_v44, %v755_v11 }
 0x19a   : > { %v757_v7 = vpop.f32.mrf.mxu0 }
 0x19c   : > { %v761_v17 = vpop.f32.mrf.mxu0 }
 0x19d   : > { %v955_v53 = vadd.f32 %v954_v41, %v761_v17  ;;  %v3415_v41 = vpack.c.bf16 %v949_v37, %v945_v19 }
 0x19e   : > { %v763_v21 = vpop.f32.mrf.mxu0 }
 0x1a0   : > { %v765_v27 = vpop.f32.mrf.mxu0 }
 0x1a1   : > { %v959_v23 = vadd.f32 %v958_v60, %v765_v27 }
 0x1a2   : > { %v767_v34 = vpop.f32.mrf.mxu0 }
 0x1a3   : > { %v3410_v3 = vpack.c.bf16 %v959_v23, %v955_v53  ;;  %v935_v23 = vadd.f32 %v3370_v13, %v741_v58  ;;  %v3992_v58 = vld [vmem:[#allocation14_spill] sm:$0xff] }
 0x1a4   : > { %v771_v32 = vpop.f32.mrf.mxu0 }
 0x1a5   : > { %v965_v18 = vadd.f32 %v964_v12, %v771_v32 }
 0x1a6   : > { %v773_v46 = vpop.f32.mrf.mxu0 }
 0x1a8   : > { %v775_v48 = vpop.f32.mrf.mxu0 }
 0x1a9   : > { %v969_v24 = vadd.f32 %v968_v26, %v775_v48  ;;  %v980_v48 = vpop.f32.mrf.mxu1 }
 0x1aa   : > { %v777_v6 = vpop.f32.mrf.mxu0 }
 0x1ab   : > { %v3406_v45 = vpack.c.bf16 %v969_v24, %v965_v18  ;;  %v939_v18 = vadd.f32 %v3374_v22, %v745_v61  ;;  %v971_v44 = vadd.f32 %v970_v28, %v777_v6  ;;  %v925_v6 = vadd.f32 %v3356_v57, %v3388_v47  ;;  %v3986_v47 = vld [vmem:[#allocation19_spill] sm:$0xff]  ;;  %v3994_v61 = vld [vmem:[#allocation21_spill] sm:$0xff] }
 0x1ac   : > { %v781_v25 = vpop.f32.mrf.mxu0  ;;  %v947_v57 = vadd.f32 %v3386_v43, %v3404_v5  ;;  %v941_v22 = vadd.f32 %v3378_v29, %v3402_v55  ;;  %v3985_v29 = vld [vmem:[#allocation17_spill] sm:$0xff]  ;;  %v3995_v55 = vld [vmem:[#allocation8_spill] sm:$0xff]  ;;  %v3997_v5 = vld [vmem:[#allocation10_spill] sm:$0xff] }
 0x1ad   : > { %1043 = vrot.lane.b32.xlu1 %v3406_v45, %s2957_s24  ;;  %v975_v59 = vadd.f32 %v974_v2, %v781_v25  ;;  %v929_v25 = vadd.f32 %v3360_v1, %v735_v54  ;;  %v3427_v37 = vpack.c.bf16 %v939_v18, %v935_v23  ;;  %v951_v2 = vadd.f32 %v3390_v38, %v757_v7  ;;  %v3987_v38 = vld [vmem:[#allocation13_spill] sm:$0xff]  ;;  %v3988_v54 = vld [vmem:[#allocation15_spill] sm:$0xff]  ;;  %v3998_v7 = vld [vmem:[#allocation20_spill] sm:$0xff] }
 0x1ae   : > { %v783_v35 = vpop.f32.mrf.mxu0  ;;  %v927_v43 = vadd.f32 %v3985_v29, %v3394_v51 }
 0x1af   : > { %v977_v60 = vadd.f32 %v976_v31, %v783_v35  ;;  %v961_v31 = vadd.f32 %v960_v63, %v767_v34  ;;  %v3443_v1 = vpack.c.bf16 %v929_v25, %v925_v6  ;;  %v3461_v19 = vpack.c.bf16 %v951_v2, %v947_v57  ;;  %v3996_v63 = vld [vmem:[#allocation5_spill] sm:$0xff] }
 0x1b0   : > { %v785_v49 = vpop.f32.mrf.mxu0  ;;  %v831_v4 = vadd.f32 %v3996_v63, %v3995_v55 }
 0x1b1   : > { %v979_v12 = vadd.f32 %v978_v10, %v785_v49  ;;  %1041 = vrot.lane.b32.xlu1 %v3410_v3, %s2957_s24  ;;  %v967_v10 = vadd.f32 %v966_v14, %v773_v46  ;;  %v957_v49 = vadd.f32 %v3398_v42, %v763_v21  ;;  %v3991_v42 = vld [vmem:[#allocation6_spill] sm:$0xff]  ;;  %v3999_v14 = vld [vmem:[#allocation7_spill] sm:$0xff] }
 0x1b2   : > { %v787_v24 = vpop.f32.mrf.mxu0  ;;  %v3503_v21 = vpack.c.bf16 %v831_v4, %v3999_v14 }
 0x1b3   : > { %v3417_v17 = vpack.c.bf16 %v979_v12, %v975_v59  ;;  %v981_v26 = vadd.f32 %v980_v48, %v787_v24  ;;  %v3430_v35 = vpack.c.bf16 %v971_v44, %v967_v10  ;;  %v919_v59 = vadd.f32 %v3348_v50, %v3384_v39 }
 0x1b4   : > { %v3446_v13 = vpack.c.bf16 %v961_v31, %v957_v49  ;;  %v3473_v39 = vpack.c.bf16 %v941_v22, %v937_v36 }
 0x1b5   : > { %v3420_v53 = vpack.c.bf16 %v981_v26, %v977_v60  ;;  %1039 = vrot.lane.b32.xlu1 %v3415_v41, %s2957_s24  ;;  %1045 = vrot.lane.b32.xlu0 %v3417_v17, %s2957_s24  ;;  %v3457_v50 = vpack.c.bf16 %v919_v59, %v3382_v30  ;;  %v931_v30 = vadd.f32 %v3364_v8, %v3396_v0  ;;  %v3989_v8 = vld [vmem:[#allocation12_spill] sm:$0xff]  ;;  %v3990_v0 = vld [vmem:[#allocation11_spill] sm:$0xff] }
 0x1b6   : > { %v841_v51 = vadd.f32 %v3991_v42, %v3990_v0 }
 0x1b7   : > { %2443 = vmatprep.subr.bf16.mxu0 %v3420_v53  ;;  %v3483_v16 = vpack.c.bf16 %v931_v30, %v927_v43 }
 0x1b8   : > { %2444 = vmatpush3.bf16.msra.mxu0 %v3366_v9  ;;  %v3498_v11 = vpack.c.bf16 %v841_v51, %v3997_v5 }
 0x1b9   : > { %1037 = vrot.lane.b32.xlu1 %v3427_v37, %s2957_s24  ;;  %1025 = vrot.lane.b32.xlu0 %v3344_v33, %s2957_s24 }
 0x1ba   : > { %2445 = vmatprep.subr.bf16.mxu0 %v3430_v35 }
 0x1bc   : > { %2446 = vmatpush3.bf16.msra.mxu0 %v3352_v52 }
 0x1bd   : > { %1035 = vrot.lane.b32.xlu1 %v3443_v1, %s2957_s24  ;;  %1023 = vrot.lane.b32.xlu0 %v3340_v15, %s2957_s24 }
 0x1be   : > { %2447 = vmatprep.subr.bf16.mxu0 %v3446_v13 }
 0x1c0   : > { %2448 = vmatpush3.bf16.msra.mxu0 %v3346_v40 }
 0x1c1   : > { %1033 = vrot.lane.b32.xlu1 %v3457_v50, %s2957_s24  ;;  %1021 = vrot.lane.b32.xlu0 %v3336_v62, %s2957_s24 }
 0x1c2   : > { %2449 = vmatprep.subr.bf16.mxu0 %v3461_v19 }
 0x1c4   : > { %2450 = vmatpush3.bf16.msra.mxu0 %v3342_v20 }
 0x1c5   : > { %1031 = vrot.lane.b32.xlu1 %v3986_v47, %s2957_s24  ;;  %1019 = vrot.lane.b32.xlu0 %v3987_v38, %s2957_s24 }
 0x1c6   : > { %2451 = vmatprep.subr.bf16.mxu0 %v3473_v39 }
 0x1c8   : > { %2452 = vmatpush3.bf16.msra.mxu0 %v3988_v54 }
 0x1c9   : > { %1017 = vrot.lane.b32.xlu0 %v3989_v8, %s2957_s24  ;;  %2453 = vmatprep.subr.bf16.mxu0 %v3483_v16 }
 0x1cc   : > { %2454 = vmatpush3.bf16.msra.mxu0 %v3992_v58 }
 0x1cd   : > { %1015 = vrot.lane.b32.xlu0 %v3993_v56, %s2957_s24  ;;  %2455 = vmatprep.subr.bf16.mxu0 %v3994_v61 }
 0x1d0   : > { %2456 = vmatpush3.bf16.msra.mxu0 %v3498_v11 }
 0x1d1   : > { %2457 = vmatprep.subr.bf16.mxu0 %v3998_v7 }
 0x1d4   : > { %2458 = vmatpush3.bf16.msra.mxu0 %v3503_v21 }
 0x1df   : > { %v1028_v34 = vpop.permute.xlu1 %1027 }
 0x1e0   : > { %v1115_v12 = vsel %vm1047_vm0, %v1028_v34, 0 }
 0x1e7   : > { %v1030_v27 = vpop.permute.xlu0 %1029 }
 0x1e8   : > { %v1118_v32 = vsel %vm1047_vm0, %v1030_v27, 0 }
 0x21f   : > { %v1044_v46 = vpop.permute.xlu1 %1043 }
 0x223   : > { %v1042_v18 = vpop.permute.xlu1 %1041 }
 0x227   : > { %v1046_v28 = vpop.permute.xlu0 %1045  ;;  %v1040_v60 = vpop.permute.xlu1 %1039 }
 0x228   : > { %2571 = vmatprep.subr.msk.bf16.mxu1 %vm1047_vm0, %v1046_v28 }
 0x229   : > { %2396 = vmatpush3.bf16.xpose.msra.mxu1 %v1118_v32 }
 0x22a   : > { %2572 = vmatprep.subr.msk.bf16.mxu1 %vm1047_vm0, %v1044_v46 }
 0x22b   : > { %v1026_v48 = vpop.permute.xlu0 %1025  ;;  %v1038_v23 = vpop.permute.xlu1 %1037 }
 0x22c   : > { %v1112_v24 = vsel %vm1047_vm0, %v1026_v48, 0 }
 0x22f   : > { %v1024_v26 = vpop.permute.xlu0 %1023  ;;  %v1036_v31 = vpop.permute.xlu1 %1035 }
 0x230   : > { %v1109_v44 = vsel %vm1047_vm0, %v1024_v26, 0 }
 0x231   : > { %2398 = vmatpush3.bf16.xpose.msra.mxu1 %v1115_v12 }
 0x232   : > { %2573 = vmatprep.subr.msk.bf16.mxu1 %vm1047_vm0, %v1042_v18 }
 0x233   : > { %v1022_v10 = vpop.permute.xlu0 %1021  ;;  %v1034_v59 = vpop.permute.xlu1 %1033 }
 0x234   : > { %v1106_v25 = vsel %vm1047_vm0, %v1022_v10, 0 }
 0x237   : > { %v1020_v6 = vpop.permute.xlu0 %1019  ;;  %v1032_v22 = vpop.permute.xlu1 %1031 }
 0x238   : > { %v1103_v49 = vsel %vm1047_vm0, %v1020_v6, 0 }
 0x239   : > { %2400 = vmatpush3.bf16.xpose.msra.mxu1 %v1112_v24 }
 0x23a   : > { %2574 = vmatprep.subr.msk.bf16.mxu1 %vm1047_vm0, %v1040_v60 }
 0x23b   : > { %v1018_v2 = vpop.permute.xlu0 %1017 }
 0x23c   : > { %v1100_v57 = vsel %vm1047_vm0, %v1018_v2, 0 }
 0x23f   : > { %v1016_v36 = vpop.permute.xlu0 %1015 }
 0x240   : > { %v1097_v30 = vsel %vm1047_vm0, %v1016_v36, 0 }
 0x241   : > { %2402 = vmatpush3.bf16.xpose.msra.mxu1 %v1109_v44 }
 0x242   : > { %2575 = vmatprep.subr.msk.bf16.mxu1 %vm1047_vm0, %v1038_v23 }
 0x249   : > { %2404 = vmatpush3.bf16.xpose.msra.mxu1 %v1106_v25 }
 0x24a   : > { %2576 = vmatprep.subr.msk.bf16.mxu1 %vm1047_vm0, %v1036_v31 }
 0x251   : > { %2406 = vmatpush3.bf16.xpose.msra.mxu1 %v1103_v49 }
 0x252   : > { %2577 = vmatprep.subr.msk.bf16.mxu1 %vm1047_vm0, %v1034_v59 }
 0x259   : > { %2408 = vmatpush3.bf16.xpose.msra.mxu1 %v1100_v57 }
 0x25a   : > { %2578 = vmatprep.subr.msk.bf16.mxu1 %vm1047_vm0, %v1032_v22 }
 0x261   : > { %2410 = vmatpush3.bf16.xpose.msra.mxu1 %v1097_v30 }
 0x262   : > { %2555 = vmatprep.subr.bf16.mxu1 %v3420_v53 }
 0x268   : > { %2412 = vmatmul.mubr.msk.bf16.vlgmr.msra.gmra.mxu1 %vm1047_vm0, %v3993_v56 }
 0x269   : > { %2413 = vmatprep.mubr.msk.bf16.mxu1 %vm1047_vm0, %v3989_v8  ;;  %2563 = vmatpush3.bf16.msra.mxu1 %v3366_v9 }
 0x26a   : > { %2556 = vmatprep.subr.bf16.mxu1 %v3430_v35 }
 0x26d   : > { %2564 = vmatpush3.bf16.msra.mxu1 %v3352_v52 }
 0x26e   : > { %2557 = vmatprep.subr.bf16.mxu1 %v3446_v13 }
 0x270   : > { %2414 = vmatmul.mubr.msk.bf16.gmra.mxu1 %vm1047_vm0, %v3989_v8 }
 0x271   : > { %2415 = vmatprep.mubr.msk.bf16.mxu1 %vm1047_vm0, %v3987_v38  ;;  %2565 = vmatpush3.bf16.msra.mxu1 %v3346_v40 }
 0x272   : > { %2558 = vmatprep.subr.bf16.mxu1 %v3461_v19 }
 0x275   : > { %2566 = vmatpush3.bf16.msra.mxu1 %v3342_v20  ;;  %v4000_v20 = vld [vmem:[#allocation16_spill] sm:$0xff] }
 0x276   : > { %2559 = vmatprep.subr.bf16.mxu1 %v3473_v39 }
 0x278   : > { %2416 = vmatmul.mubr.msk.bf16.gmra.mxu1 %vm1047_vm0, %v3987_v38 }
 0x279   : > { %2417 = vmatprep.mubr.msk.bf16.mxu1 %vm1047_vm0, %v3336_v62  ;;  %2567 = vmatpush3.bf16.msra.mxu1 %v3988_v54 }
 0x27a   : > { %2560 = vmatprep.subr.bf16.mxu1 %v3483_v16 }
 0x27d   : > { %2568 = vmatpush3.bf16.msra.mxu1 %v3992_v58 }
 0x27e   : > { %2561 = vmatprep.subr.bf16.mxu1 %v3994_v61 }
 0x280   : > { %2418 = vmatmul.mubr.msk.bf16.gmra.mxu1 %vm1047_vm0, %v3336_v62  ;;  %v4001_v62 = vld [vmem:[#allocation18_spill] sm:$0xff] }
 0x281   : > { %2419 = vmatprep.mubr.msk.bf16.mxu1 %vm1047_vm0, %v3340_v15  ;;  %2569 = vmatpush3.bf16.msra.mxu1 %v3498_v11 }
 0x282   : > { %2562 = vmatprep.subr.bf16.mxu1 %v3998_v7 }
 0x285   : > { %2570 = vmatpush3.bf16.msra.mxu1 %v3503_v21 }
 0x288   : > { %2420 = vmatmul.mubr.msk.bf16.gmra.mxu1 %vm1047_vm0, %v3340_v15  ;;  %v1401_v15 = vlaneseq }
 0x289   : > { %2421 = vmatprep.mubr.msk.bf16.mxu1 %vm1047_vm0, %v3344_v33 }
 0x28a   : > { %v3602_v40 = vand.u32 127, %v1401_v15 }
 0x290   : > { %2422 = vmatmul.mubr.msk.bf16.gmra.mxu1 %vm1047_vm0, %v3344_v33  ;;  %v3600_v33 = vshrl.u32 %v1401_v15, 7 }
 0x291   : > { %2423 = vmatprep.mubr.msk.bf16.mxu1 %vm1047_vm0, %v4000_v20 }
 0x292   : > { %vm1437_vm1 = vcmp.le.s32.totalorder %v3602_v40, %v3600_v33  ;;  %v1407_v0 = vadd.s32 40, %v3600_v33  ;;  %v1408_v61 = vadd.s32 48, %v3600_v33  ;;  %v1409_v11 = vadd.s32 56, %v3600_v33 }
 0x293   : > { %v1410_v34 = vadd.s32 64, %v3600_v33  ;;  %v1411_v18 = vadd.s32 72, %v3600_v33  ;;  %v1412_v44 = vadd.s32 80, %v3600_v33  ;;  %v1413_v6 = vadd.s32 88, %v3600_v33 }
 0x294   : > { %vm1447_vm6 = vcmp.le.s32.totalorder %v3602_v40, %v1407_v0  ;;  %vm1449_vm7 = vcmp.le.s32.totalorder %v3602_v40, %v1408_v61  ;;  %vm1451_vm8 = vcmp.le.s32.totalorder %v3602_v40, %v1409_v11  ;;  %v1414_v22 = vadd.s32 96, %v3600_v33 }
 0x295   : > { %vm1453_vm9 = vcmp.le.s32.totalorder %v3602_v40, %v1410_v34  ;;  %vm1455_vm10 = vcmp.le.s32.totalorder %v3602_v40, %v1411_v18  ;;  %vm1457_vm11 = vcmp.le.s32.totalorder %v3602_v40, %v1412_v44  ;;  %vm1459_vm12 = vcmp.le.s32.totalorder %v3602_v40, %v1413_v6 }
 0x296   : > { %vm1461_vm13 = vcmp.le.s32.totalorder %v3602_v40, %v1414_v22  ;;  %v1415_v15 = vadd.s32 104, %v3600_v33  ;;  %v3683_v0 = vadd.s32 128, %v3602_v40  ;;  %v1419_v61 = vadd.s32 136, %v3600_v33 }
 0x297   : > { %v1422_v6 = vadd.s32 160, %v3600_v33 }
 0x298   : > { %2424 = vmatmul.mubr.msk.bf16.gmra.mxu1 %vm1047_vm0, %v4000_v20  ;;  %vm1463_vm14 = vcmp.le.s32.totalorder %v3602_v40, %v1415_v15 }
 0x299   : > { %2425 = vmatprep.mubr.msk.bf16.mxu1 %vm1047_vm0, %v4001_v62 }
 0x2a0   : > { %2426 = vmatmul.mubr.msk.bf16.gmra.mxu1 %vm1047_vm0, %v4001_v62 }
 0x2a1   : > { %2427 = vmatprep.mubr.msk.bf16.mxu1 %vm1047_vm0, %v3986_v47 }
 0x2a8   : > { %2428 = vmatmul.mubr.msk.bf16.gmra.mxu1 %vm1047_vm0, %v3986_v47  ;;  %v1406_v47 = vadd.s32 32, %v3600_v33 }
 0x2a9   : > { %2429 = vmatprep.mubr.msk.bf16.mxu1 %vm1047_vm0, %v3457_v50 }
 0x2aa   : > { %vm1445_vm5 = vcmp.le.s32.totalorder %v3602_v40, %v1406_v47 }
 0x2b0   : > { %2430 = vmatmul.mubr.msk.bf16.gmra.mxu1 %vm1047_vm0, %v3457_v50  ;;  %v1405_v50 = vadd.s32 24, %v3600_v33 }
 0x2b1   : > { %2431 = vmatprep.mubr.msk.bf16.mxu1 %vm1047_vm0, %v3443_v1 }
 0x2b2   : > { %vm1443_vm4 = vcmp.le.s32.totalorder %v3602_v40, %v1405_v50  ;;  %v1417_v50 = vadd.s32 120, %v3600_v33 }
 0x2b8   : > { %2432 = vmatmul.mubr.msk.bf16.gmra.mxu1 %vm1047_vm0, %v3443_v1 }
 0x2b9   : > { %2433 = vmatprep.mubr.msk.bf16.mxu1 %vm1047_vm0, %v3427_v37 }
 0x2c0   : > { %2434 = vmatmul.mubr.msk.bf16.gmra.mxu1 %vm1047_vm0, %v3427_v37 }
 0x2c1   : > { %2435 = vmatprep.mubr.msk.bf16.mxu1 %vm1047_vm0, %v3415_v41 }
 0x2c8   : > { %2436 = vmatmul.mubr.msk.bf16.gmra.mxu1 %vm1047_vm0, %v3415_v41 }
 0x2c9   : > { %2437 = vmatprep.mubr.msk.bf16.mxu1 %vm1047_vm0, %v3410_v3 }
 0x2d0   : > { %2438 = vmatmul.mubr.msk.bf16.gmra.mxu1 %vm1047_vm0, %v3410_v3  ;;  %v1403_v3 = vadd.s32 8, %v3600_v33 }
 0x2d1   : > { %2439 = vmatprep.mubr.msk.bf16.mxu1 %vm1047_vm0, %v3406_v45 }
 0x2d2   : > { %vm1439_vm2 = vcmp.le.s32.totalorder %v3602_v40, %v1403_v3 }
 0x2d8   : > { %2440 = vmatmul.mubr.msk.bf16.gmra.mxu1 %vm1047_vm0, %v3406_v45 }
 0x2d9   : > { %2441 = vmatprep.mubr.msk.bf16.mxu1 %vm1047_vm0, %v3417_v17 }
 0x2e0   : > { %2442 = vmatmul.mubr.msk.bf16.gmra.mxu1 %vm1047_vm0, %v3417_v17  ;;  %v1404_v17 = vadd.s32 16, %v3600_v33 }
 0x2e2   : > { %vm1441_vm3 = vcmp.le.s32.totalorder %v3602_v40, %v1404_v17 }
 0x328   : > { %v1178_v52 = vpop.f32.mrf.mxu1 }
 0x329   : > { %v1337_v9 = vmul.f32 0.05103104, %v1178_v52 }
 0x32a   : > { %v1180_v41 = vpop.f32.mrf.mxu1 }
 0x32b   : > { %v3607_v45 = vsel %vm1437_vm1, %v1337_v9, -inf  ;;  %vm1467_vm1 = vcmp.le.s32.totalorder %v3602_v40, %v1417_v50 }
 0x32c   : > { %1566 = vmax.xlane.f32.xlu0 %v3607_v45  ;;  %v1182_v53 = vpop.f32.mrf.mxu1 }
 0x32d   : > { %v1339_v37 = vmul.f32 0.05103104, %v1182_v53  ;;  %v1416_v53 = vadd.s32 112, %v3600_v33 }
 0x32e   : > { %v1184_v35 = vpop.f32.mrf.mxu1 }
 0x32f   : > { %v3612_v1 = vsel %vm1439_vm2, %v1339_v37, -inf  ;;  %vm1465_vm15 = vcmp.le.s32.totalorder %v3602_v40, %v1416_v53 }
 0x330   : > { %1569 = vmax.xlane.f32.xlu1 %v3612_v1  ;;  %v1188_v13 = vpop.f32.mrf.mxu1 }
 0x331   : > { %v1341_v19 = vmul.f32 0.05103104, %v1188_v13 }
 0x332   : > { %v1190_v39 = vpop.f32.mrf.mxu1 }
 0x333   : > { %v3617_v29 = vsel %vm1441_vm3, %v1341_v19, -inf  ;;  %vm1472_vm3 = vcmp.le.s32.totalorder %v3683_v0, %v1419_v61 }
 0x334   : > { %1572 = vmax.xlane.f32.xlu0 %v3617_v29  ;;  %v1192_v43 = vpop.f32.mrf.mxu1 }
 0x335   : > { %v1343_v38 = vmul.f32 0.05103104, %v1192_v43 }
 0x336   : > { %v1194_v16 = vpop.f32.mrf.mxu1 }
 0x337   : > { %v3622_v54 = vsel %vm1443_vm4, %v1343_v38, -inf }
 0x338   : > { %1575 = vmax.xlane.f32.xlu0 %v3622_v54  ;;  %v1198_v8 = vpop.f32.mrf.mxu1 }
 0x339   : > { %v1345_v42 = vmul.f32 0.05103104, %v1198_v8  ;;  %v1418_v8 = vadd.s32 128, %v3600_v33 }
 0x33a   : > { %v1200_v51 = vpop.f32.mrf.mxu1 }
 0x33b   : > { %v3627_v58 = vsel %vm1445_vm5, %v1345_v42, -inf  ;;  %vm1470_vm2 = vcmp.le.s32.totalorder %v3683_v0, %v1418_v8 }
 0x33c   : > { %1578 = vmax.xlane.f32.xlu1 %v3627_v58  ;;  %v1202_v56 = vpop.f32.mrf.mxu1 }
 0x33d   : > { %v1347_v55 = vmul.f32 0.05103104, %v1202_v56 }
 0x33e   : > { %v1204_v63 = vpop.f32.mrf.mxu1 }
 0x33f   : > { %v3632_v4 = vsel %vm1447_vm6, %v1347_v55, -inf  ;;  %vm1478_vm6 = vcmp.le.s32.totalorder %v3683_v0, %v1422_v6 }
 0x340   : > { %1581 = vmax.xlane.f32.xlu0 %v3632_v4  ;;  %v1208_v5 = vpop.f32.mrf.mxu1 }
 0x341   : > { %v1349_v7 = vmul.f32 0.05103104, %v1208_v5 }
 0x342   : > { %v1210_v14 = vpop.f32.mrf.mxu1 }
 0x343   : > { %v3637_v21 = vsel %vm1449_vm7, %v1349_v7, -inf  ;;  %v1420_v14 = vadd.s32 144, %v3600_v33 }
 0x344   : > { %1584 = vmax.xlane.f32.xlu1 %v3637_v21  ;;  %v1212_v27 = vpop.f32.mrf.mxu1 }
 0x345   : > { %v1351_v28 = vmul.f32 0.05103104, %v1212_v27  ;;  %vm1474_vm4 = vcmp.le.s32.totalorder %v3683_v0, %v1420_v14 }
 0x346   : > { %v1214_v32 = vpop.f32.mrf.mxu1 }
 0x347   : > { %v3642_v46 = vsel %vm1451_vm8, %v1351_v28, -inf }
 0x348   : > { %1587 = vmax.xlane.f32.xlu0 %v3642_v46  ;;  %v1218_v12 = vpop.f32.mrf.mxu1 }
 0x349   : > { %v1353_v48 = vmul.f32 0.05103104, %v1218_v12 }
 0x34a   : > { %v1220_v24 = vpop.f32.mrf.mxu1 }
 0x34b   : > { %v3647_v60 = vsel %vm1453_vm9, %v1353_v48, -inf  ;;  %v1421_v48 = vadd.s32 152, %v3600_v33 }
 0x34c   : > { %1590 = vmax.xlane.f32.xlu1 %v3647_v60  ;;  %v1222_v26 = vpop.f32.mrf.mxu1 }
 0x34d   : > { %v1355_v23 = vmul.f32 0.05103104, %v1222_v26  ;;  %vm1476_vm5 = vcmp.le.s32.totalorder %v3683_v0, %v1421_v48  ;;  %v1427_v48 = vadd.s32 200, %v3600_v33 }
 0x34e   : > { %v1224_v10 = vpop.f32.mrf.mxu1 }
 0x34f   : > { %v3652_v25 = vsel %vm1455_vm10, %v1355_v23, -inf }
 0x350   : > { %1593 = vmax.xlane.f32.xlu0 %v3652_v25  ;;  %v1228_v31 = vpop.f32.mrf.mxu1 }
 0x351   : > { %v1357_v49 = vmul.f32 0.05103104, %v1228_v31 }
 0x352   : > { %v1230_v59 = vpop.f32.mrf.mxu1 }
 0x353   : > { %v3657_v2 = vsel %vm1457_vm11, %v1357_v49, -inf  ;;  %vm1488_vm11 = vcmp.le.s32.totalorder %v3683_v0, %v1427_v48 }
 0x354   : > { %1596 = vmax.xlane.f32.xlu1 %v3657_v2  ;;  %v1232_v57 = vpop.f32.mrf.mxu1 }
 0x355   : > { %v1359_v36 = vmul.f32 0.05103104, %v1232_v57 }
 0x356   : > { %v1234_v30 = vpop.f32.mrf.mxu1 }
 0x357   : > { %v3662_v20 = vsel %vm1459_vm12, %v1359_v36, -inf }
 0x358   : > { %1599 = vmax.xlane.f32.xlu0 %v3662_v20  ;;  %v1238_v62 = vpop.f32.mrf.mxu1 }
 0x359   : > { %v1361_v52 = vmul.f32 0.05103104, %v1238_v62  ;;  %v1423_v62 = vadd.s32 168, %v3600_v33 }
 0x35a   : > { %v1240_v3 = vpop.f32.mrf.mxu1 }
 0x35b   : > { %v3667_v9 = vsel %vm1461_vm13, %v1361_v52, -inf  ;;  %vm1480_vm7 = vcmp.le.s32.totalorder %v3683_v0, %v1423_v62 }
 0x35c   : > { %1602 = vmax.xlane.f32.xlu1 %v3667_v9  ;;  %v1242_v41 = vpop.f32.mrf.mxu1 }
 0x35d   : > { %v1363_v17 = vmul.f32 0.05103104, %v1242_v41 }
 0x35e   : > { %v1244_v37 = vpop.f32.mrf.mxu1 }
 0x35f   : > { %v3672_v35 = vsel %vm1463_vm14, %v1363_v17, -inf  ;;  %v1424_v37 = vadd.s32 176, %v3600_v33 }
 0x360   : > { %1605 = vmax.xlane.f32.xlu0 %v3672_v35  ;;  %v1248_v13 = vpop.f32.mrf.mxu1 }
 0x361   : > { %v1365_v19 = vmul.f32 0.05103104, %v1248_v13  ;;  %vm1482_vm8 = vcmp.le.s32.totalorder %v3683_v0, %v1424_v37  ;;  %v1430_v37 = vadd.s32 224, %v3600_v33 }
 0x362   : > { %v1250_v39 = vpop.f32.mrf.mxu1 }
 0x363   : > { %v3677_v43 = vsel %vm1465_vm15, %v1365_v19, -inf  ;;  %vm1494_vm12 = vcmp.le.s32.totalorder %v3683_v0, %v1430_v37 }
 0x364   : > { %1608 = vmax.xlane.f32.xlu1 %v3677_v43  ;;  %v1252_v47 = vpop.f32.mrf.mxu1 }
 0x365   : > { %v1367_v38 = vmul.f32 0.05103104, %v1252_v47 }
 0x366   : > { %v1254_v16 = vpop.f32.mrf.mxu1 }
 0x367   : > { %v3685_v42 = vsel %vm1467_vm1, %v1367_v38, -inf  ;;  %v1425_v16 = vadd.s32 184, %v3600_v33 }
 0x368   : > { %1611 = vmax.xlane.f32.xlu0 %v3685_v42  ;;  %v1258_v51 = vpop.f32.mrf.mxu1 }
 0x369   : > { %v3690_v63 = vmul.f32 0.05103104, %v1258_v51  ;;  %vm1484_vm9 = vcmp.le.s32.totalorder %v3683_v0, %v1425_v16 }
 0x36a   : > { %v1260_v56 = vpop.f32.mrf.mxu1 }
 0x36b   : > { %v1370_v55 = vmul.f32 0.05103104, %v1260_v56 }
 0x36c   : > { %v1262_v5 = vpop.f32.mrf.mxu1 }
 0x36d   : > { %v3692_v11 = vsel %vm1470_vm2, %v1370_v55, -inf  ;;  %v3698_v34 = vmul.f32 0.05103104, %v1262_v5 }
 0x36e   : > { %v1264_v7 = vpop.f32.mrf.mxu1  ;;  %v1613_v40 = vmax.f32 %v3690_v63, %v3692_v11 }
 0x36f   : > { %v1372_v27 = vmul.f32 0.05103104, %v1264_v7  ;;  %v1426_v7 = vadd.s32 192, %v3600_v33 }
 0x370   : > { %1614 = vmax.xlane.f32.xlu1 %v1613_v40  ;;  %v1268_v28 = vpop.f32.mrf.mxu1 }
 0x371   : > { %v3700_v32 = vsel %vm1472_vm3, %v1372_v27, -inf  ;;  %v3706_v26 = vmul.f32 0.05103104, %v1268_v28  ;;  %vm1486_vm10 = vcmp.le.s32.totalorder %v3683_v0, %v1426_v7 }
 0x372   : > { %v1270_v12 = vpop.f32.mrf.mxu1  ;;  %v1616_v18 = vmax.f32 %v3698_v34, %v3700_v32 }
 0x373   : > { %v1374_v24 = vmul.f32 0.05103104, %v1270_v12 }
 0x374   : > { %1617 = vmax.xlane.f32.xlu0 %v1616_v18  ;;  %v1272_v44 = vpop.f32.mrf.mxu1 }
 0x375   : > { %v3708_v23 = vsel %vm1474_vm4, %v1374_v24, -inf  ;;  %v3714_v59 = vmul.f32 0.05103104, %v1272_v44 }
 0x376   : > { %v1274_v10 = vpop.f32.mrf.mxu1  ;;  %v1619_v31 = vmax.f32 %v3706_v26, %v3708_v23 }
 0x377   : > { %v1376_v49 = vmul.f32 0.05103104, %v1274_v10 }
 0x378   : > { %1620 = vmax.xlane.f32.xlu1 %v1619_v31  ;;  %v1278_v57 = vpop.f32.mrf.mxu1 }
 0x379   : > { %v3716_v22 = vsel %vm1476_vm5, %v1376_v49, -inf  ;;  %v3722_v52 = vmul.f32 0.05103104, %v1278_v57 }
 0x37a   : > { %v1280_v36 = vpop.f32.mrf.mxu1  ;;  %v1622_v30 = vmax.f32 %v3714_v59, %v3716_v22 }
 0x37b   : > { %v1378_v15 = vmul.f32 0.05103104, %v1280_v36 }
 0x37c   : > { %1623 = vmax.xlane.f32.xlu0 %v1622_v30  ;;  %v1282_v3 = vpop.f32.mrf.mxu1 }
 0x37d   : > { %v3724_v41 = vsel %vm1478_vm6, %v1378_v15, -inf  ;;  %v3730_v50 = vmul.f32 0.05103104, %v1282_v3 }
 0x37e   : > { %v1284_v53 = vpop.f32.mrf.mxu1  ;;  %v1625_v17 = vmax.f32 %v3722_v52, %v3724_v41 }
 0x37f   : > { %v1380_v13 = vmul.f32 0.05103104, %v1284_v53 }
 0x380   : > { %1626 = vmax.xlane.f32.xlu1 %v1625_v17  ;;  %v1288_v19 = vpop.f32.mrf.mxu1 }
 0x381   : > { %v3732_v39 = vsel %vm1480_vm7, %v1380_v13, -inf  ;;  %v3738_v51 = vmul.f32 0.05103104, %v1288_v19  ;;  %v1428_v19 = vadd.s32 208, %v3600_v33 }
 0x382   : > { %v1290_v47 = vpop.f32.mrf.mxu1  ;;  %v1628_v38 = vmax.f32 %v3730_v50, %v3732_v39 }
 0x383   : > { %v1382_v8 = vmul.f32 0.05103104, %v1290_v47  ;;  %vm1490_vm13 = vcmp.le.s32.totalorder %v3683_v0, %v1428_v19 }
 0x384   : > { %1629 = vmax.xlane.f32.xlu0 %v1628_v38  ;;  %v1292_v56 = vpop.f32.mrf.mxu1  ;;  %v1431_v38 = vadd.s32 232, %v3600_v33 }
 0x385   : > { %v3740_v61 = vsel %vm1482_vm8, %v1382_v8, -inf  ;;  %v3746_v14 = vmul.f32 0.05103104, %v1292_v56 }
 0x386   : > { %v1294_v55 = vpop.f32.mrf.mxu1  ;;  %v1631_v5 = vmax.f32 %v3738_v51, %v3740_v61  ;;  %vm1496_vm14 = vcmp.le.s32.totalorder %v3683_v0, %v1431_v38 }
 0x387   : > { %v1384_v40 = vmul.f32 0.05103104, %v1294_v55 }
 0x388   : > { %1632 = vmax.xlane.f32.xlu1 %v1631_v5  ;;  %v1298_v27 = vpop.f32.mrf.mxu1  ;;  %v1429_v5 = vadd.s32 216, %v3600_v33 }
 0x389   : > { %v3748_v28 = vsel %vm1484_vm9, %v1384_v40, -inf  ;;  %v3754_v44 = vmul.f32 0.05103104, %v1298_v27 }
 0x38a   : > { %v1300_v12 = vpop.f32.mrf.mxu1  ;;  %v1634_v18 = vmax.f32 %v3746_v14, %v3748_v28  ;;  %vm1492_vm15 = vcmp.le.s32.totalorder %v3683_v0, %v1429_v5 }
 0x38b   : > { %v1386_v24 = vmul.f32 0.05103104, %v1300_v12  ;;  %v1432_v12 = vadd.s32 240, %v3600_v33 }
 0x38c   : > { %1635 = vmax.xlane.f32.xlu0 %v1634_v18  ;;  %v1302_v10 = vpop.f32.mrf.mxu1 }
 0x38d   : > { %v3756_v31 = vsel %vm1486_vm10, %v1386_v24, -inf  ;;  %v3761_v36 = vmul.f32 0.05103104, %v1302_v10  ;;  %vm1498_vm1 = vcmp.le.s32.totalorder %v3683_v0, %v1432_v12 }
 0x38e   : > { %v1304_v6 = vpop.f32.mrf.mxu1  ;;  %v1637_v49 = vmax.f32 %v3754_v44, %v3756_v31 }
 0x38f   : > { %v1388_v57 = vmul.f32 0.05103104, %v1304_v6 }
 0x390   : > { %1638 = vmax.xlane.f32.xlu1 %v1637_v49  ;;  %v1308_v30 = vpop.f32.mrf.mxu1 }
 0x391   : > { %v3763_v62 = vsel %vm1488_vm11, %v1388_v57, -inf  ;;  %v3783_v10 = vmul.f32 0.05103104, %v1308_v30  ;;  %v1433_v30 = vadd.s32 248, %v3600_v33 }
 0x392   : > { %v1310_v15 = vpop.f32.mrf.mxu1  ;;  %v1640_v3 = vmax.f32 %v3761_v36, %v3763_v62 }
 0x393   : > { %v1390_v16 = vmul.f32 0.05103104, %v1310_v15  ;;  %vm1500_vm2 = vcmp.le.s32.totalorder %v3683_v0, %v1433_v30 }
 0x394   : > { %1641 = vmax.xlane.f32.xlu0 %v1640_v3  ;;  %v1312_v53 = vpop.f32.mrf.mxu1 }
 0x395   : > { %v3781_v24 = vsel %vm1490_vm13, %v1390_v16, -inf  ;;  %v3798_v19 = vmul.f32 0.05103104, %v1312_v53 }
 0x396   : > { %v1314_v17 = vpop.f32.mrf.mxu1  ;;  %v1643_v3 = vmax.f32 %v3783_v10, %v3781_v24 }
 0x397   : > { %v1392_v18 = vmul.f32 0.05103104, %v1314_v17 }
 0x398   : > { %v1318_v13 = vpop.f32.mrf.mxu1 }
 0x399   : > { %v3771_v56 = vmul.f32 0.05103104, %v1318_v13  ;;  %v3796_v13 = vsel %vm1492_vm15, %v1392_v18, -inf }
 0x39a   : > { %v1320_v47 = vpop.f32.mrf.mxu1 }
 0x39b   : > { %v1394_v8 = vmul.f32 0.05103104, %v1320_v47 }
 0x39c   : > { %v1322_v55 = vpop.f32.mrf.mxu1 }
 0x39d   : > { %v3775_v7 = vsel %vm1494_vm12, %v1394_v8, -inf  ;;  %v3785_v6 = vmul.f32 0.05103104, %v1322_v55  ;;  %v1646_v55 = vmax.f32 %v3798_v19, %v3796_v13 }
 0x39e   : > { %v1324_v40 = vpop.f32.mrf.mxu1  ;;  %v1649_v27 = vmax.f32 %v3771_v56, %v3775_v7 }
 0x39f   : > { %v1396_v48 = vmul.f32 0.05103104, %v1324_v40 }
 0x3a0   : > { %1650 = vmax.xlane.f32.xlu1 %v1649_v27  ;;  %v1328_v49 = vpop.f32.mrf.mxu1 }
 0x3a1   : > { %v3788_v57 = vsel %vm1496_vm14, %v1396_v48, -inf  ;;  %v3800_v47 = vmul.f32 0.05103104, %v1328_v49 }
 0x3a2   : > { %v1330_v15 = vpop.f32.mrf.mxu1  ;;  %v1652_v17 = vmax.f32 %v3785_v6, %v3788_v57 }
 0x3a3   : > { %v1398_v37 = vmul.f32 0.05103104, %v1330_v15 }
 0x3a4   : > { %1644 = vmax.xlane.f32.xlu1 %v1643_v3  ;;  %1653 = vmax.xlane.f32.xlu0 %v1652_v17  ;;  %v1332_v38 = vpop.f32.mrf.mxu1 }
 0x3a5   : > { %v3802_v16 = vsel %vm1498_vm1, %v1398_v37, -inf  ;;  %v3809_v40 = vmul.f32 0.05103104, %v1332_v38 }
 0x3a6   : > { %v1334_v8 = vpop.f32.mrf.mxu1  ;;  %v1655_v5 = vmax.f32 %v3800_v47, %v3802_v16 }
 0x3a7   : > { %v1400_v33 = vmul.f32 0.05103104, %v1334_v8 }
 0x3a8   : > { %1647 = vmax.xlane.f32.xlu0 %v1646_v55  ;;  %1656 = vmax.xlane.f32.xlu1 %v1655_v5 }
 0x3a9   : > { %v3811_v53 = vsel %vm1500_vm2, %v1400_v33, -inf }
 0x3aa   : > { %v1658_v27 = vmax.f32 %v3809_v40, %v3811_v53 }
 0x3ac   : > { %1659 = vmax.xlane.f32.xlu0 %v1658_v27 }
 0x3b5   : > { %v1567_v12 = vpop.xlane.xlu0 %1566 }
 0x3b6   : > { %v1661_v18 = vsub.f32 %v3607_v45, %v1567_v12  ;;  %v1662_v48 = vsub.f32 -inf, %v1567_v12 }
 0x3b8   : > { %v1725_v49 = vmul.f32 1.442695, %v1661_v18  ;;  %v1727_v15 = vmul.f32 1.442695, %v1662_v48 }
 0x3b9   : > { %v1570_v3 = vpop.xlane.xlu1 %1569 }
 0x3ba   : > { %2697 = vpow2.f32 %v1725_v49  ;;  %v1663_v0 = vsub.f32 %v3612_v1, %v1570_v3  ;;  %v1664_v17 = vsub.f32 -inf, %v1570_v3 }
 0x3bb   : > { %2699 = vpow2.f32 %v1727_v15 }
 0x3bc   : > { %v1729_v30 = vmul.f32 1.442695, %v1663_v0  ;;  %v1731_v37 = vmul.f32 1.442695, %v1664_v17 }
 0x3bd   : > { %v1573_v38 = vpop.xlane.xlu0 %1572 }
 0x3be   : > { %2701 = vpow2.f32 %v1729_v30  ;;  %v1665_v8 = vsub.f32 %v3617_v29, %v1573_v38  ;;  %v1666_v55 = vsub.f32 -inf, %v1573_v38 }
 0x3bf   : > { %2703 = vpow2.f32 %v1731_v37 }
 0x3c0   : > { %v1733_v5 = vmul.f32 1.442695, %v1665_v8  ;;  %v1735_v33 = vmul.f32 1.442695, %v1666_v55 }
 0x3c1   : > { %v1576_v45 = vpop.xlane.xlu0 %1575 }
 0x3c2   : > { %2705 = vpow2.f32 %v1733_v5  ;;  %v1667_v27 = vsub.f32 %v3622_v54, %v1576_v45  ;;  %v1668_v12 = vsub.f32 -inf, %v1576_v45 }
 0x3c3   : > { %2707 = vpow2.f32 %v1735_v33 }
 0x3c4   : > { %v1737_v18 = vmul.f32 1.442695, %v1667_v27  ;;  %v1739_v1 = vmul.f32 1.442695, %v1668_v12 }
 0x3c5   : > { %v1579_v48 = vpop.xlane.xlu1 %1578 }
 0x3c6   : > { %2709 = vpow2.f32 %v1737_v18  ;;  %v1669_v49 = vsub.f32 %v3627_v58, %v1579_v48  ;;  %v1670_v15 = vsub.f32 -inf, %v1579_v48 }
 0x3c7   : > { %v2698_v3 = vpop.eup %2697  ;;  %2711 = vpow2.f32 %v1739_v1 }
 0x3c8   : > { %v2700_v29 = vpop.eup %2699  ;;  %v1741_v0 = vmul.f32 1.442695, %v1669_v49  ;;  %v1743_v17 = vmul.f32 1.442695, %v1670_v15 }
 0x3c9   : > { %v1582_v30 = vpop.xlane.xlu0 %1581  ;;  %v1853_v37 = vadd.f32 %v2700_v29, %v2698_v3 }
 0x3ca   : > { %2713 = vpow2.f32 %v1741_v0  ;;  %v1671_v38 = vsub.f32 %v3632_v4, %v1582_v30  ;;  %v1672_v54 = vsub.f32 -inf, %v1582_v30 }
 0x3cb   : > { %v2702_v8 = vpop.eup %2701  ;;  %2715 = vpow2.f32 %v1743_v17  ;;  %1854 = vadd.xlane.f32.xlu1 %v1853_v37 }
 0x3cc   : > { %v2704_v55 = vpop.eup %2703  ;;  %v1745_v5 = vmul.f32 1.442695, %v1671_v38  ;;  %v1747_v33 = vmul.f32 1.442695, %v1672_v54  ;;  %v1949_v45 = vpack.c.bf16 %v2702_v8, %v2698_v3 }
 0x3cd   : > { %v1585_v58 = vpop.xlane.xlu1 %1584  ;;  %v1950_v27 = vpack.c.bf16 %v2704_v55, %v2700_v29  ;;  %v1856_v12 = vadd.f32 %v2704_v55, %v2702_v8 }
 0x3ce   : > { %2717 = vpow2.f32 %v1745_v5  ;;  %v1673_v18 = vsub.f32 %v3637_v21, %v1585_v58  ;;  %v1674_v1 = vsub.f32 -inf, %v1585_v58 }
 0x3cf   : > { %v2706_v48 = vpop.eup %2705  ;;  %2719 = vpow2.f32 %v1747_v33  ;;  %2029 = vmatprep.mubr.bf16.mxu0 %v1950_v27  ;;  %1857 = vadd.xlane.f32.xlu0 %v1856_v12 }
 0x3d0   : > { %v2708_v4 = vpop.eup %2707  ;;  %v1749_v49 = vmul.f32 1.442695, %v1673_v18  ;;  %v1751_v15 = vmul.f32 1.442695, %v1674_v1  ;;  %2030 = vmatmul.mubr.bf16.vlgmr.msra.gmra.mxu0 %v1949_v45 }
 0x3d1   : > { %v1588_v0 = vpop.xlane.xlu0 %1587  ;;  %v1859_v17 = vadd.f32 %v2708_v4, %v2706_v48 }
 0x3d2   : > { %2721 = vpow2.f32 %v1749_v49  ;;  %v1675_v3 = vsub.f32 %v3642_v46, %v1588_v0  ;;  %v1676_v30 = vsub.f32 -inf, %v1588_v0 }
 0x3d3   : > { %v2710_v29 = vpop.eup %2709  ;;  %2723 = vpow2.f32 %v1751_v15  ;;  %1860 = vadd.xlane.f32.xlu1 %v1859_v17 }
 0x3d4   : > { %v2712_v37 = vpop.eup %2711  ;;  %v1753_v21 = vmul.f32 1.442695, %v1675_v3  ;;  %v1755_v38 = vmul.f32 1.442695, %v1676_v30  ;;  %v1951_v54 = vpack.c.bf16 %v2710_v29, %v2706_v48 }
 0x3d5   : > { %v1591_v8 = vpop.xlane.xlu1 %1590  ;;  %v1862_v55 = vadd.f32 %v2712_v37, %v2710_v29  ;;  %v1952_v5 = vpack.c.bf16 %v2712_v37, %v2708_v4 }
 0x3d6   : > { %2725 = vpow2.f32 %v1753_v21  ;;  %v1677_v33 = vsub.f32 %v3647_v60, %v1591_v8  ;;  %v1678_v45 = vsub.f32 -inf, %v1591_v8 }
 0x3d7   : > { %v2714_v58 = vpop.eup %2713  ;;  %2727 = vpow2.f32 %v1755_v38  ;;  %1863 = vadd.xlane.f32.xlu0 %v1862_v55  ;;  %2037 = vmatprep.mubr.bf16.mxu0 %v1952_v5 }
 0x3d8   : > { %v2716_v46 = vpop.eup %2715  ;;  %v1757_v27 = vmul.f32 1.442695, %v1677_v33  ;;  %v1759_v12 = vmul.f32 1.442695, %v1678_v45  ;;  %2038 = vmatmul.mubr.bf16.gmra.mxu0 %v1951_v54 }
 0x3d9   : > { %v1594_v18 = vpop.xlane.xlu0 %1593  ;;  %v1865_v1 = vadd.f32 %v2716_v46, %v2714_v58 }
 0x3da   : > { %2729 = vpow2.f32 %v1757_v27  ;;  %v1679_v48 = vsub.f32 %v3652_v25, %v1594_v18  ;;  %v1680_v49 = vsub.f32 -inf, %v1594_v18 }
 0x3db   : > { %v2718_v15 = vpop.eup %2717  ;;  %2731 = vpow2.f32 %v1759_v12  ;;  %1866 = vadd.xlane.f32.xlu1 %v1865_v1 }
 0x3dc   : > { %v2720_v4 = vpop.eup %2719  ;;  %v1761_v60 = vmul.f32 1.442695, %v1679_v48  ;;  %v1763_v0 = vmul.f32 1.442695, %v1680_v49  ;;  %v1953_v17 = vpack.c.bf16 %v2718_v15, %v2714_v58 }
 0x3dd   : > { %v1597_v3 = vpop.xlane.xlu1 %1596  ;;  %v1868_v30 = vadd.f32 %v2720_v4, %v2718_v15  ;;  %v1954_v29 = vpack.c.bf16 %v2720_v4, %v2716_v46 }
 0x3de   : > { %2733 = vpow2.f32 %v1761_v60  ;;  %v1681_v37 = vsub.f32 %v3657_v2, %v1597_v3  ;;  %v1682_v21 = vsub.f32 -inf, %v1597_v3 }
 0x3df   : > { %v2722_v38 = vpop.eup %2721  ;;  %2735 = vpow2.f32 %v1763_v0  ;;  %1869 = vadd.xlane.f32.xlu0 %v1868_v30  ;;  %2045 = vmatprep.mubr.bf16.mxu0 %v1954_v29 }
 0x3e0   : > { %v2724_v25 = vpop.eup %2723  ;;  %v1765_v54 = vmul.f32 1.442695, %v1681_v37  ;;  %v1767_v8 = vmul.f32 1.442695, %v1682_v21  ;;  %2046 = vmatmul.mubr.bf16.gmra.mxu0 %v1953_v17 }
 0x3e1   : > { %v1600_v55 = vpop.xlane.xlu0 %1599  ;;  %v1871_v5 = vadd.f32 %v2724_v25, %v2722_v38 }
 0x3e2   : > { %2737 = vpow2.f32 %v1765_v54  ;;  %v1683_v33 = vsub.f32 %v3662_v20, %v1600_v55  ;;  %v1684_v45 = vsub.f32 -inf, %v1600_v55 }
 0x3e3   : > { %v2726_v58 = vpop.eup %2725  ;;  %2739 = vpow2.f32 %v1767_v8  ;;  %1872 = vadd.xlane.f32.xlu1 %v1871_v5 }
 0x3e4   : > { %v2728_v46 = vpop.eup %2727  ;;  %v1769_v2 = vmul.f32 1.442695, %v1683_v33  ;;  %v1771_v27 = vmul.f32 1.442695, %v1684_v45  ;;  %v1955_v12 = vpack.c.bf16 %v2726_v58, %v2722_v38 }
 0x3e5   : > { %v1603_v18 = vpop.xlane.xlu1 %1602  ;;  %v1874_v1 = vadd.f32 %v2728_v46, %v2726_v58  ;;  %v1956_v48 = vpack.c.bf16 %v2728_v46, %v2724_v25 }
 0x3e6   : > { %2741 = vpow2.f32 %v1769_v2  ;;  %v1685_v49 = vsub.f32 %v3667_v9, %v1603_v18  ;;  %v1686_v15 = vsub.f32 -inf, %v1603_v18 }
 0x3e7   : > { %v2730_v4 = vpop.eup %2729  ;;  %2743 = vpow2.f32 %v1771_v27  ;;  %1875 = vadd.xlane.f32.xlu0 %v1874_v1  ;;  %2053 = vmatprep.mubr.bf16.mxu0 %v1956_v48 }
 0x3e8   : > { %v2732_v20 = vpop.eup %2731  ;;  %v1773_v60 = vmul.f32 1.442695, %v1685_v49  ;;  %v1775_v0 = vmul.f32 1.442695, %v1686_v15  ;;  %2054 = vmatmul.mubr.bf16.gmra.mxu0 %v1955_v12 }
 0x3e9   : > { %v1606_v17 = vpop.xlane.xlu0 %1605  ;;  %v1877_v3 = vadd.f32 %v2732_v20, %v2730_v4 }
 0x3ea   : > { %2745 = vpow2.f32 %v1773_v60  ;;  %v1687_v30 = vsub.f32 %v3672_v35, %v1606_v17  ;;  %v1688_v29 = vsub.f32 -inf, %v1606_v17 }
 0x3eb   : > { %v2734_v37 = vpop.eup %2733  ;;  %2747 = vpow2.f32 %v1775_v0  ;;  %1878 = vadd.xlane.f32.xlu1 %v1877_v3 }
 0x3ec   : > { %v2736_v21 = vpop.eup %2735  ;;  %v1777_v9 = vmul.f32 1.442695, %v1687_v30  ;;  %v1779_v38 = vmul.f32 1.442695, %v1688_v29  ;;  %v1957_v25 = vpack.c.bf16 %v2734_v37, %v2730_v4 }
 0x3ed   : > { %v1609_v54 = vpop.xlane.xlu1 %1608  ;;  %v1880_v8 = vadd.f32 %v2736_v21, %v2734_v37  ;;  %v1958_v55 = vpack.c.bf16 %v2736_v21, %v2732_v20 }
 0x3ee   : > { %2749 = vpow2.f32 %v1777_v9  ;;  %v1689_v5 = vsub.f32 %v3677_v43, %v1609_v54  ;;  %v1690_v33 = vsub.f32 -inf, %v1609_v54 }
 0x3ef   : > { %v2738_v45 = vpop.eup %2737  ;;  %2751 = vpow2.f32 %v1779_v38  ;;  %1881 = vadd.xlane.f32.xlu0 %v1880_v8  ;;  %2061 = vmatprep.mubr.bf16.mxu0 %v1958_v55 }
 0x3f0   : > { %v2740_v35 = vpop.eup %2739  ;;  %v1781_v58 = vmul.f32 1.442695, %v1689_v5  ;;  %v1783_v46 = vmul.f32 1.442695, %v1690_v33  ;;  %2062 = vmatmul.mubr.bf16.gmra.mxu0 %v1957_v25 }
 0x3f1   : > { %v1612_v2 = vpop.xlane.xlu0 %1611  ;;  %v1883_v27 = vadd.f32 %v2740_v35, %v2738_v45 }
 0x3f2   : > { %2753 = vpow2.f32 %v1781_v58  ;;  %v1691_v12 = vsub.f32 %v3685_v42, %v1612_v2  ;;  %v1692_v18 = vsub.f32 -inf, %v1612_v2 }
 0x3f3   : > { %v2742_v1 = vpop.eup %2741  ;;  %2755 = vpow2.f32 %v1783_v46  ;;  %1884 = vadd.xlane.f32.xlu1 %v1883_v27 }
 0x3f4   : > { %v2744_v48 = vpop.eup %2743  ;;  %v1785_v43 = vmul.f32 1.442695, %v1691_v12  ;;  %v1787_v49 = vmul.f32 1.442695, %v1692_v18  ;;  %v1959_v15 = vpack.c.bf16 %v2742_v1, %v2738_v45 }
 0x3f5   : > { %v1886_v4 = vadd.f32 %v2744_v48, %v2742_v1  ;;  %v1960_v20 = vpack.c.bf16 %v2744_v48, %v2740_v35 }
 0x3f6   : > { %2757 = vpow2.f32 %v1785_v43 }
 0x3f7   : > { %v2746_v60 = vpop.eup %2745  ;;  %2759 = vpow2.f32 %v1787_v49  ;;  %1887 = vadd.xlane.f32.xlu0 %v1886_v4  ;;  %2069 = vmatprep.mubr.bf16.mxu0 %v1960_v20 }
 0x3f8   : > { %v2748_v0 = vpop.eup %2747  ;;  %2070 = vmatmul.mubr.bf16.gmra.mxu0 %v1959_v15 }
 0x3f9   : > { %v1615_v17 = vpop.xlane.xlu1 %1614  ;;  %v1889_v3 = vadd.f32 %v2748_v0, %v2746_v60 }
 0x3fa   : > { %v1693_v42 = vsub.f32 %v3690_v63, %v1615_v17  ;;  %v1694_v30 = vsub.f32 %v3692_v11, %v1615_v17 }
 0x3fb   : > { %v2750_v29 = vpop.eup %2749  ;;  %1890 = vadd.xlane.f32.xlu1 %v1889_v3 }
 0x3fc   : > { %v2752_v37 = vpop.eup %2751  ;;  %v1789_v21 = vmul.f32 1.442695, %v1693_v42  ;;  %v1791_v9 = vmul.f32 1.442695, %v1694_v30  ;;  %v1961_v38 = vpack.c.bf16 %v2750_v29, %v2746_v60 }
 0x3fd   : > { %v1618_v25 = vpop.xlane.xlu0 %1617  ;;  %v1892_v54 = vadd.f32 %v2752_v37, %v2750_v29  ;;  %v1962_v8 = vpack.c.bf16 %v2752_v37, %v2748_v0 }
 0x3fe   : > { %2761 = vpow2.f32 %v1789_v21  ;;  %v1695_v55 = vsub.f32 %v3698_v34, %v1618_v25  ;;  %v1696_v5 = vsub.f32 %v3700_v32, %v1618_v25 }
 0x3ff   : > { %v2754_v33 = vpop.eup %2753  ;;  %2763 = vpow2.f32 %v1791_v9  ;;  %1893 = vadd.xlane.f32.xlu0 %v1892_v54  ;;  %2077 = vmatprep.mubr.bf16.mxu0 %v1962_v8 }
 0x400   : > { %v2756_v63 = vpop.eup %2755  ;;  %v1793_v11 = vmul.f32 1.442695, %v1695_v55  ;;  %v1795_v45 = vmul.f32 1.442695, %v1696_v5  ;;  %2078 = vmatmul.mubr.bf16.gmra.mxu0 %v1961_v38 }
 0x401   : > { %v1621_v35 = vpop.xlane.xlu1 %1620  ;;  %v1895_v58 = vadd.f32 %v2756_v63, %v2754_v33 }
 0x402   : > { %2765 = vpow2.f32 %v1793_v11  ;;  %v1697_v46 = vsub.f32 %v3706_v26, %v1621_v35  ;;  %v1698_v2 = vsub.f32 %v3708_v23, %v1621_v35 }
 0x403   : > { %v2758_v27 = vpop.eup %2757  ;;  %2767 = vpow2.f32 %v1795_v45  ;;  %1896 = vadd.xlane.f32.xlu1 %v1895_v58 }
 0x404   : > { %v2760_v34 = vpop.eup %2759  ;;  %v1797_v32 = vmul.f32 1.442695, %v1697_v46  ;;  %v1799_v12 = vmul.f32 1.442695, %v1698_v2  ;;  %v1963_v18 = vpack.c.bf16 %v2758_v27, %v2754_v33 }
 0x405   : > { %v1624_v1 = vpop.xlane.xlu0 %1623  ;;  %v1898_v48 = vadd.f32 %v2760_v34, %v2758_v27  ;;  %v1964_v43 = vpack.c.bf16 %v2760_v34, %v2756_v63 }
 0x406   : > { %2769 = vpow2.f32 %v1797_v32  ;;  %v1699_v49 = vsub.f32 %v3714_v59, %v1624_v1  ;;  %v1700_v15 = vsub.f32 %v3716_v22, %v1624_v1 }
 0x407   : > { %2771 = vpow2.f32 %v1799_v12  ;;  %1899 = vadd.xlane.f32.xlu0 %v1898_v48  ;;  %2085 = vmatprep.mubr.bf16.mxu0 %v1964_v43 }
 0x408   : > { %v1801_v26 = vmul.f32 1.442695, %v1699_v49  ;;  %v1803_v23 = vmul.f32 1.442695, %v1700_v15  ;;  %2086 = vmatmul.mubr.bf16.gmra.mxu0 %v1963_v18 }
 0x409   : > { %v1627_v4 = vpop.xlane.xlu1 %1626 }
 0x40a   : > { %2773 = vpow2.f32 %v1801_v26  ;;  %v1701_v20 = vsub.f32 %v3722_v52, %v1627_v4  ;;  %v1702_v60 = vsub.f32 %v3724_v41, %v1627_v4 }
 0x40b   : > { %v2762_v0 = vpop.eup %2761  ;;  %2775 = vpow2.f32 %v1803_v23 }
 0x40c   : > { %v2764_v17 = vpop.eup %2763  ;;  %v1805_v3 = vmul.f32 1.442695, %v1701_v20  ;;  %v1807_v42 = vmul.f32 1.442695, %v1702_v60 }
 0x40d   : > { %v1630_v59 = vpop.xlane.xlu0 %1629  ;;  %v1901_v30 = vadd.f32 %v2764_v17, %v2762_v0 }
 0x40e   : > { %2777 = vpow2.f32 %v1805_v3  ;;  %v1703_v22 = vsub.f32 %v3730_v50, %v1630_v59  ;;  %v1704_v29 = vsub.f32 %v3732_v39, %v1630_v59 }
 0x40f   : > { %v2766_v37 = vpop.eup %2765  ;;  %2779 = vpow2.f32 %v1807_v42  ;;  %1902 = vadd.xlane.f32.xlu1 %v1901_v30 }
 0x410   : > { %v2768_v21 = vpop.eup %2767  ;;  %v1809_v9 = vmul.f32 1.442695, %v1703_v22  ;;  %v1811_v52 = vmul.f32 1.442695, %v1704_v29  ;;  %v1965_v38 = vpack.c.bf16 %v2766_v37, %v2762_v0 }
 0x411   : > { %v1633_v41 = vpop.xlane.xlu1 %1632  ;;  %v1904_v25 = vadd.f32 %v2768_v21, %v2766_v37  ;;  %v1966_v54 = vpack.c.bf16 %v2768_v21, %v2764_v17 }
 0x412   : > { %2781 = vpow2.f32 %v1809_v9  ;;  %v1705_v8 = vsub.f32 %v3738_v51, %v1633_v41  ;;  %v1706_v55 = vsub.f32 %v3740_v61, %v1633_v41 }
 0x413   : > { %v2770_v5 = vpop.eup %2769  ;;  %2783 = vpow2.f32 %v1811_v52  ;;  %1905 = vadd.xlane.f32.xlu0 %v1904_v25  ;;  %2093 = vmatprep.mubr.bf16.mxu0 %v1966_v54 }
 0x414   : > { %v2772_v50 = vpop.eup %2771  ;;  %v1813_v39 = vmul.f32 1.442695, %v1705_v8  ;;  %v1815_v33 = vmul.f32 1.442695, %v1706_v55  ;;  %2094 = vmatmul.mubr.bf16.gmra.mxu0 %v1965_v38 }
 0x415   : > { %v1636_v63 = vpop.xlane.xlu0 %1635  ;;  %v1907_v11 = vadd.f32 %v2772_v50, %v2770_v5 }
 0x416   : > { %2785 = vpow2.f32 %v1813_v39  ;;  %v1707_v45 = vsub.f32 %v3746_v14, %v1636_v63  ;;  %v1708_v35 = vsub.f32 %v3748_v28, %v1636_v63 }
 0x417   : > { %v2774_v58 = vpop.eup %2773  ;;  %2787 = vpow2.f32 %v1815_v33  ;;  %1908 = vadd.xlane.f32.xlu1 %v1907_v11 }
 0x418   : > { %v2776_v51 = vpop.eup %2775  ;;  %v1817_v61 = vmul.f32 1.442695, %v1707_v45  ;;  %v1819_v46 = vmul.f32 1.442695, %v1708_v35  ;;  %v1967_v2 = vpack.c.bf16 %v2774_v58, %v2770_v5 }
 0x419   : > { %v1639_v27 = vpop.xlane.xlu1 %1638  ;;  %v1910_v34 = vadd.f32 %v2776_v51, %v2774_v58  ;;  %v1968_v32 = vpack.c.bf16 %v2776_v51, %v2772_v50 }
 0x41a   : > { %2789 = vpow2.f32 %v1817_v61  ;;  %v1709_v12 = vsub.f32 %v3754_v44, %v1639_v27  ;;  %v1710_v18 = vsub.f32 %v3756_v31, %v1639_v27 }
 0x41b   : > { %v2778_v1 = vpop.eup %2777  ;;  %2791 = vpow2.f32 %v1819_v46  ;;  %1911 = vadd.xlane.f32.xlu0 %v1910_v34  ;;  %2101 = vmatprep.mubr.bf16.mxu0 %v1968_v32 }
 0x41c   : > { %v2780_v14 = vpop.eup %2779  ;;  %v1821_v28 = vmul.f32 1.442695, %v1709_v12  ;;  %v1823_v48 = vmul.f32 1.442695, %v1710_v18  ;;  %2102 = vmatmul.mubr.bf16.gmra.mxu0 %v1967_v2 }
 0x41d   : > { %v1642_v43 = vpop.xlane.xlu0 %1641  ;;  %v1913_v49 = vadd.f32 %v2780_v14, %v2778_v1 }
 0x41e   : > { %2793 = vpow2.f32 %v1821_v28  ;;  %v1711_v15 = vsub.f32 %v3761_v36, %v1642_v43  ;;  %v1712_v26 = vsub.f32 %v3763_v62, %v1642_v43 }
 0x41f   : > { %v2782_v23 = vpop.eup %2781  ;;  %2795 = vpow2.f32 %v1823_v48  ;;  %1914 = vadd.xlane.f32.xlu1 %v1913_v49 }
 0x420   : > { %v2784_v44 = vpop.eup %2783  ;;  %v1825_v31 = vmul.f32 1.442695, %v1711_v15  ;;  %v1827_v4 = vmul.f32 1.442695, %v1712_v26  ;;  %v1969_v20 = vpack.c.bf16 %v2782_v23, %v2778_v1 }
 0x421   : > { %v1916_v60 = vadd.f32 %v2784_v44, %v2782_v23  ;;  %v1970_v0 = vpack.c.bf16 %v2784_v44, %v2780_v14 }
 0x422   : > { %2797 = vpow2.f32 %v1825_v31 }
 0x423   : > { %v2786_v17 = vpop.eup %2785  ;;  %2799 = vpow2.f32 %v1827_v4  ;;  %1917 = vadd.xlane.f32.xlu0 %v1916_v60  ;;  %2109 = vmatprep.mubr.bf16.mxu0 %v1970_v0 }
 0x424   : > { %v2788_v3 = vpop.eup %2787  ;;  %2110 = vmatmul.mubr.bf16.gmra.mxu0 %v1969_v20 }
 0x425   : > { %v1919_v42 = vadd.f32 %v2788_v3, %v2786_v17 }
 0x427   : > { %v2790_v36 = vpop.eup %2789  ;;  %1920 = vadd.xlane.f32.xlu1 %v1919_v42 }
 0x428   : > { %v2792_v62 = vpop.eup %2791  ;;  %v1971_v59 = vpack.c.bf16 %v2790_v36, %v2786_v17 }
 0x429   : > { %v1651_v30 = vpop.xlane.xlu1 %1650  ;;  %v1922_v22 = vadd.f32 %v2792_v62, %v2790_v36  ;;  %v1972_v29 = vpack.c.bf16 %v2792_v62, %v2788_v3 }
 0x42a   : > { %v1717_v37 = vsub.f32 %v3771_v56, %v1651_v30  ;;  %v1718_v21 = vsub.f32 %v3775_v7, %v1651_v30 }
 0x42b   : > { %v2794_v9 = vpop.eup %2793  ;;  %1923 = vadd.xlane.f32.xlu0 %v1922_v22  ;;  %2117 = vmatprep.mubr.bf16.mxu0 %v1972_v29 }
 0x42c   : > { %v2796_v52 = vpop.eup %2795  ;;  %v1837_v38 = vmul.f32 1.442695, %v1717_v37  ;;  %2118 = vmatmul.mubr.bf16.gmra.mxu0 %v1971_v59  ;;  %v1839_v41 = vmul.f32 1.442695, %v1718_v21 }
 0x42d   : > { %v1645_v25 = vpop.xlane.xlu1 %1644  ;;  %v1654_v54 = vpop.xlane.xlu0 %1653  ;;  %v1925_v8 = vadd.f32 %v2796_v52, %v2794_v9 }
 0x42e   : > { %v1713_v55 = vsub.f32 %v3783_v10, %v1645_v25  ;;  %v1714_v5 = vsub.f32 %v3781_v24, %v1645_v25  ;;  %v1719_v50 = vsub.f32 %v3785_v6, %v1654_v54  ;;  %2801 = vpow2.f32 %v1837_v38 }
 0x42f   : > { %v2798_v39 = vpop.eup %2797  ;;  %v1720_v56 = vsub.f32 %v3788_v57, %v1654_v54  ;;  %1926 = vadd.xlane.f32.xlu1 %v1925_v8  ;;  %2803 = vpow2.f32 %v1839_v41 }
 0x430   : > { %v2800_v7 = vpop.eup %2799  ;;  %v1829_v33 = vmul.f32 1.442695, %v1713_v55  ;;  %v1831_v63 = vmul.f32 1.442695, %v1714_v5  ;;  %v1841_v11 = vmul.f32 1.442695, %v1719_v50  ;;  %v1973_v45 = vpack.c.bf16 %v2798_v39, %v2794_v9 }
 0x431   : > { %v1843_v35 = vmul.f32 1.442695, %v1720_v56  ;;  %v1648_v58 = vpop.xlane.xlu0 %1647  ;;  %v1657_v51 = vpop.xlane.xlu1 %1656  ;;  %v1928_v61 = vadd.f32 %v2800_v7, %v2798_v39  ;;  %v1974_v10 = vpack.c.bf16 %v2800_v7, %v2796_v52 }
 0x432   : > { %2805 = vpow2.f32 %v1829_v33  ;;  %v1715_v24 = vsub.f32 %v3798_v19, %v1648_v58  ;;  %v1716_v6 = vsub.f32 %v3796_v13, %v1648_v58  ;;  %v1721_v46 = vsub.f32 %v3800_v47, %v1657_v51 }
 0x433   : > { %2807 = vpow2.f32 %v1831_v63  ;;  %v1722_v57 = vsub.f32 %v3802_v16, %v1657_v51  ;;  %1929 = vadd.xlane.f32.xlu0 %v1928_v61  ;;  %2125 = vmatprep.mubr.bf16.mxu0 %v1974_v10 }
 0x434   : > { %2809 = vpow2.f32 %v1841_v11  ;;  %v1833_v2 = vmul.f32 1.442695, %v1715_v24  ;;  %v1835_v27 = vmul.f32 1.442695, %v1716_v6  ;;  %v1845_v34 = vmul.f32 1.442695, %v1721_v46  ;;  %2126 = vmatmul.mubr.bf16.gmra.mxu0 %v1973_v45 }
 0x435   : > { %2811 = vpow2.f32 %v1843_v35  ;;  %v1847_v32 = vmul.f32 1.442695, %v1722_v57  ;;  %v1660_v12 = vpop.xlane.xlu0 %1659 }
 0x436   : > { %2813 = vpow2.f32 %v1833_v2  ;;  %v1723_v19 = vsub.f32 %v3809_v40, %v1660_v12  ;;  %v1724_v13 = vsub.f32 %v3811_v53, %v1660_v12 }
 0x437   : > { %2815 = vpow2.f32 %v1835_v27 }
 0x438   : > { %2817 = vpow2.f32 %v1845_v34  ;;  %v1849_v47 = vmul.f32 1.442695, %v1723_v19  ;;  %v1851_v18 = vmul.f32 1.442695, %v1724_v13 }
 0x439   : > { %2819 = vpow2.f32 %v1847_v32 }
 0x43a   : > { %2821 = vpow2.f32 %v1849_v47 }
 0x43b   : > { %2823 = vpow2.f32 %v1851_v18  ;;  %v2802_v16 = vpop.eup %2801 }
 0x43c   : > { %v2804_v1 = vpop.eup %2803 }
 0x43d   : > { %v1937_v44 = vadd.f32 %v2804_v1, %v2802_v16 }
 0x43f   : > { %v2806_v14 = vpop.eup %2805 }
 0x440   : > { %v2808_v28 = vpop.eup %2807 }
 0x441   : > { %v2810_v48 = vpop.eup %2809  ;;  %v1931_v43 = vadd.f32 %v2808_v28, %v2806_v14 }
 0x442   : > { %v2812_v49 = vpop.eup %2811  ;;  %v1977_v15 = vpack.c.bf16 %v2810_v48, %v2802_v16 }
 0x443   : > { %v2814_v26 = vpop.eup %2813  ;;  %v1978_v23 = vpack.c.bf16 %v2812_v49, %v2804_v1  ;;  %1932 = vadd.xlane.f32.xlu1 %v1931_v43  ;;  %v1940_v42 = vadd.f32 %v2812_v49, %v2810_v48 }
 0x444   : > { %v2816_v40 = vpop.eup %2815  ;;  %v1975_v20 = vpack.c.bf16 %v2814_v26, %v2806_v14 }
 0x445   : > { %v2818_v53 = vpop.eup %2817  ;;  %2141 = vmatprep.mubr.bf16.mxu1 %v1978_v23  ;;  %v1934_v31 = vadd.f32 %v2816_v40, %v2814_v26  ;;  %v1976_v4 = vpack.c.bf16 %v2816_v40, %v2808_v28 }
 0x446   : > { %v2820_v60 = vpop.eup %2819  ;;  %2142 = vmatmul.mubr.bf16.vlgmr.msra.gmra.mxu1 %v1977_v15 }
 0x447   : > { %v2822_v0 = vpop.eup %2821  ;;  %1938 = vadd.xlane.f32.xlu1 %v1937_v44  ;;  %1935 = vadd.xlane.f32.xlu0 %v1934_v31  ;;  %v1943_v3 = vadd.f32 %v2820_v60, %v2818_v53 }
 0x448   : > { %v2824_v17 = vpop.eup %2823  ;;  %2133 = vmatprep.mubr.bf16.mxu0 %v1976_v4  ;;  %v1979_v62 = vpack.c.bf16 %v2822_v0, %v2818_v53 }
 0x449   : > { %2134 = vmatmul.mubr.bf16.gmra.mxu0 %v1975_v20  ;;  %v1980_v36 = vpack.c.bf16 %v2824_v17, %v2820_v60  ;;  %v1946_v59 = vadd.f32 %v2824_v17, %v2822_v0 }
 0x44b   : > { %1944 = vadd.xlane.f32.xlu1 %v1943_v3  ;;  %1941 = vadd.xlane.f32.xlu0 %v1940_v42 }
 0x44c   : > { %2149 = vmatprep.mubr.bf16.mxu1 %v1980_v36 }
 0x44e   : > { %2150 = vmatmul.mubr.bf16.gmra.mxu1 %v1979_v62 }
 0x44f   : > { %1947 = vadd.xlane.f32.xlu0 %v1946_v59 }
 0x454   : > { %v1855_v30 = vpop.xlane.xlu1 %1854 }
 0x455   : > { %2825 = vrcp.f32 %v1855_v30 }
 0x458   : > { %v1858_v22 = vpop.xlane.xlu0 %1857 }
 0x459   : > { %2827 = vrcp.f32 %v1858_v22 }
 0x45c   : > { %v1861_v29 = vpop.xlane.xlu1 %1860 }
 0x45d   : > { %2829 = vrcp.f32 %v1861_v29 }
 0x460   : > { %v1864_v37 = vpop.xlane.xlu0 %1863 }
 0x461   : > { %2831 = vrcp.f32 %v1864_v37 }
 0x462   : > { %v2826_v38 = vpop.eup %2825 }
 0x464   : > { %v1867_v41 = vpop.xlane.xlu1 %1866 }
 0x465   : > { %2833 = vrcp.f32 %v1867_v41 }
 0x466   : > { %v2828_v5 = vpop.eup %2827 }
 0x468   : > { %v1870_v50 = vpop.xlane.xlu0 %1869 }
 0x469   : > { %2835 = vrcp.f32 %v1870_v50 }
 0x46a   : > { %v2830_v63 = vpop.eup %2829 }
 0x46c   : > { %v1873_v11 = vpop.xlane.xlu1 %1872 }
 0x46d   : > { %2837 = vrcp.f32 %v1873_v11 }
 0x46e   : > { %v2832_v61 = vpop.eup %2831 }
 0x470   : > { %v1876_v10 = vpop.xlane.xlu0 %1875 }
 0x471   : > { %2839 = vrcp.f32 %v1876_v10 }
 0x472   : > { %v2834_v2 = vpop.eup %2833 }
 0x474   : > { %v1879_v27 = vpop.xlane.xlu1 %1878 }
 0x475   : > { %2841 = vrcp.f32 %v1879_v27 }
 0x476   : > { %v2836_v13 = vpop.eup %2835 }
 0x478   : > { %v1882_v47 = vpop.xlane.xlu0 %1881 }
 0x479   : > { %2843 = vrcp.f32 %v1882_v47 }
 0x47a   : > { %v2838_v28 = vpop.eup %2837 }
 0x47c   : > { %v1885_v48 = vpop.xlane.xlu1 %1884 }
 0x47d   : > { %2845 = vrcp.f32 %v1885_v48 }
 0x47e   : > { %v2840_v23 = vpop.eup %2839 }
 0x480   : > { %v1888_v40 = vpop.xlane.xlu0 %1887 }
 0x481   : > { %2847 = vrcp.f32 %v1888_v40 }
 0x482   : > { %v2842_v20 = vpop.eup %2841 }
 0x484   : > { %v1891_v60 = vpop.xlane.xlu1 %1890 }
 0x485   : > { %2849 = vrcp.f32 %v1891_v60 }
 0x486   : > { %v2844_v36 = vpop.eup %2843 }
 0x488   : > { %v1894_v62 = vpop.xlane.xlu0 %1893 }
 0x489   : > { %2851 = vrcp.f32 %v1894_v62 }
 0x48a   : > { %v2846_v37 = vpop.eup %2845 }
 0x490   : > { %v2459_v21 = vpop.f32.mrf.mxu0 }
 0x492   : > { %v2460_v9 = vpop.f32.mrf.mxu0 }
 0x493   : > { %v2461_v52 = vadd.f32 %v2460_v9, %v2459_v21  ;;  %v1897_v21 = vpop.xlane.xlu1 %1896 }
 0x494   : > { %v2462_v25 = vpop.f32.mrf.mxu0  ;;  %2853 = vrcp.f32 %v1897_v21 }
 0x495   : > { %v2190_v54 = vmul.f32 %v2826_v38, %v2461_v52 }
 0x496   : > { %v2463_v8 = vpop.f32.mrf.mxu0 }
 0x497   : > { %2222 = vst.msk [vmem:[%s3868_s5] sm:$0xff] %vm1047_vm0, %v2190_v54  ;;  %v2464_v55 = vadd.f32 %v2463_v8, %v2462_v25  ;;  %v2848_v25 = vpop.eup %2847  ;;  %v1900_v54 = vpop.xlane.xlu0 %1899 }
 0x498   : > { %v2465_v39 = vpop.f32.mrf.mxu0  ;;  %2855 = vrcp.f32 %v1900_v54 }
 0x499   : > { %v2191_v56 = vmul.f32 %v2828_v5, %v2464_v55 }
 0x49a   : > { %v2466_v7 = vpop.f32.mrf.mxu0 }
 0x49b   : > { %2223 = vst.msk [vmem:[%s3868_s5 + $0x8] sm:$0xff] %vm1047_vm0, %v2191_v56  ;;  %v2467_v33 = vadd.f32 %v2466_v7, %v2465_v39  ;;  %v2850_v39 = vpop.eup %2849 }
 0x49c   : > { %v2468_v45 = vpop.f32.mrf.mxu0  ;;  %v2852_v11 = vpop.eup %2851 }
 0x49d   : > { %v2192_v35 = vmul.f32 %v2830_v63, %v2467_v33 }
 0x49e   : > { %v2469_v58 = vpop.f32.mrf.mxu0 }
 0x49f   : > { %2224 = vst.msk [vmem:[%s3868_s5 + $0x10] sm:$0xff] %vm1047_vm0, %v2192_v35  ;;  %v2470_v51 = vadd.f32 %v2469_v58, %v2468_v45  ;;  %v1903_v35 = vpop.xlane.xlu1 %1902 }
 0x4a0   : > { %v2471_v24 = vpop.f32.mrf.mxu0  ;;  %2857 = vrcp.f32 %v1903_v35 }
 0x4a1   : > { %v2193_v6 = vmul.f32 %v2832_v61, %v2470_v51  ;;  %v2854_v10 = vpop.eup %2853 }
 0x4a2   : > { %v2472_v46 = vpop.f32.mrf.mxu0 }
 0x4a3   : > { %2225 = vst.msk [vmem:[%s3868_s5 + $0x18] sm:$0xff] %vm1047_vm0, %v2193_v6  ;;  %v2473_v57 = vadd.f32 %v2472_v46, %v2471_v24  ;;  %v1906_v6 = vpop.xlane.xlu0 %1905 }
 0x4a4   : > { %v2474_v34 = vpop.f32.mrf.mxu0  ;;  %2859 = vrcp.f32 %v1906_v6 }
 0x4a5   : > { %v2194_v32 = vmul.f32 %v2834_v2, %v2473_v57  ;;  %v2856_v27 = vpop.eup %2855 }
 0x4a6   : > { %v2475_v12 = vpop.f32.mrf.mxu0 }
 0x4a7   : > { %2226 = vst.msk [vmem:[%s3868_s5 + $0x20] sm:$0xff] %vm1047_vm0, %v2194_v32  ;;  %v2476_v19 = vadd.f32 %v2475_v12, %v2474_v34  ;;  %v1909_v34 = vpop.xlane.xlu1 %1908  ;;  %v1912_v12 = vpop.xlane.xlu0 %1911 }
 0x4a8   : > { %v2477_v18 = vpop.f32.mrf.mxu0  ;;  %2861 = vrcp.f32 %v1909_v34 }
 0x4a9   : > { %v2195_v16 = vmul.f32 %v2836_v13, %v2476_v19  ;;  %2863 = vrcp.f32 %v1912_v12 }
 0x4aa   : > { %v2478_v1 = vpop.f32.mrf.mxu0 }
 0x4ab   : > { %2227 = vst.msk [vmem:[%s3868_s5 + $0x28] sm:$0xff] %vm1047_vm0, %v2195_v16  ;;  %v2479_v14 = vadd.f32 %v2478_v1, %v2477_v18  ;;  %v1915_v16 = vpop.xlane.xlu1 %1914 }
 0x4ac   : > { %v2480_v43 = vpop.f32.mrf.mxu0  ;;  %2865 = vrcp.f32 %v1915_v16 }
 0x4ad   : > { %v2196_v49 = vmul.f32 %v2838_v28, %v2479_v14  ;;  %v2858_v18 = vpop.eup %2857 }
 0x4ae   : > { %v2481_v15 = vpop.f32.mrf.mxu0 }
 0x4af   : > { %2228 = vst.msk [vmem:[%s3868_s5 + $0x30] sm:$0xff] %vm1047_vm0, %v2196_v49  ;;  %v2482_v26 = vadd.f32 %v2481_v15, %v2480_v43  ;;  %v1918_v49 = vpop.xlane.xlu0 %1917 }
 0x4b0   : > { %v2483_v53 = vpop.f32.mrf.mxu0  ;;  %2867 = vrcp.f32 %v1918_v49 }
 0x4b1   : > { %v2197_v44 = vmul.f32 %v2840_v23, %v2482_v26  ;;  %v2860_v43 = vpop.eup %2859 }
 0x4b2   : > { %v2484_v31 = vpop.f32.mrf.mxu0 }
 0x4b3   : > { %2229 = vst.msk [vmem:[%s3868_s5 + $0x38] sm:$0xff] %vm1047_vm0, %v2197_v44  ;;  %v2485_v4 = vadd.f32 %v2484_v31, %v2483_v53  ;;  %v1921_v44 = vpop.xlane.xlu1 %1920 }
 0x4b4   : > { %v2486_v0 = vpop.f32.mrf.mxu0  ;;  %2869 = vrcp.f32 %v1921_v44 }
 0x4b5   : > { %v2198_v17 = vmul.f32 %v2842_v20, %v2485_v4  ;;  %v2862_v53 = vpop.eup %2861 }
 0x4b6   : > { %v2487_v3 = vpop.f32.mrf.mxu0 }
 0x4b7   : > { %2230 = vst.msk [vmem:[%s3868_s5 + $0x40] sm:$0xff] %vm1047_vm0, %v2198_v17  ;;  %v2488_v42 = vadd.f32 %v2487_v3, %v2486_v0  ;;  %v2864_v0 = vpop.eup %2863  ;;  %v1924_v17 = vpop.xlane.xlu0 %1923 }
 0x4b8   : > { %v2489_v59 = vpop.f32.mrf.mxu0  ;;  %2871 = vrcp.f32 %v1924_v17 }
 0x4b9   : > { %v2199_v30 = vmul.f32 %v2844_v36, %v2488_v42 }
 0x4ba   : > { %v2490_v22 = vpop.f32.mrf.mxu0 }
 0x4bb   : > { %2231 = vst.msk [vmem:[%s3868_s5 + $0x48] sm:$0xff] %vm1047_vm0, %v2199_v30  ;;  %v2491_v29 = vadd.f32 %v2490_v22, %v2489_v59  ;;  %v2866_v59 = vpop.eup %2865  ;;  %v1927_v30 = vpop.xlane.xlu1 %1926 }
 0x4bc   : > { %v2492_v9 = vpop.f32.mrf.mxu0  ;;  %2873 = vrcp.f32 %v1927_v30 }
 0x4bd   : > { %v2200_v52 = vmul.f32 %v2846_v37, %v2491_v29 }
 0x4be   : > { %v2493_v38 = vpop.f32.mrf.mxu0 }
 0x4bf   : > { %2232 = vst.msk [vmem:[%s3868_s5 + $0x50] sm:$0xff] %vm1047_vm0, %v2200_v52  ;;  %v2494_v41 = vadd.f32 %v2493_v38, %v2492_v9  ;;  %v2868_v9 = vpop.eup %2867  ;;  %v1930_v52 = vpop.xlane.xlu0 %1929 }
 0x4c0   : > { %v2495_v8 = vpop.f32.mrf.mxu0  ;;  %2875 = vrcp.f32 %v1930_v52 }
 0x4c1   : > { %v2201_v55 = vmul.f32 %v2848_v25, %v2494_v41 }
 0x4c2   : > { %v2496_v5 = vpop.f32.mrf.mxu0 }
 0x4c3   : > { %2233 = vst.msk [vmem:[%s3868_s5 + $0x58] sm:$0xff] %vm1047_vm0, %v2201_v55  ;;  %v2497_v50 = vadd.f32 %v2496_v5, %v2495_v8  ;;  %v2870_v8 = vpop.eup %2869 }
 0x4c4   : > { %v2498_v56 = vpop.f32.mrf.mxu0 }
 0x4c5   : > { %v2202_v7 = vmul.f32 %v2850_v39, %v2497_v50 }
 0x4c6   : > { %v2499_v33 = vpop.f32.mrf.mxu0 }
 0x4c7   : > { %2234 = vst.msk [vmem:[%s3868_s5 + $0x60] sm:$0xff] %vm1047_vm0, %v2202_v7  ;;  %v2500_v63 = vadd.f32 %v2499_v33, %v2498_v56  ;;  %v2872_v7 = vpop.eup %2871 }
 0x4c8   : > { %v2501_v45 = vpop.f32.mrf.mxu0 }
 0x4c9   : > { %v2203_v58 = vmul.f32 %v2852_v11, %v2500_v63 }
 0x4ca   : > { %v2502_v51 = vpop.f32.mrf.mxu0 }
 0x4cb   : > { %2235 = vst.msk [vmem:[%s3868_s5 + $0x68] sm:$0xff] %vm1047_vm0, %v2203_v58  ;;  %v2503_v61 = vadd.f32 %v2502_v51, %v2501_v45  ;;  %v2874_v58 = vpop.eup %2873 }
 0x4cc   : > { %v2504_v24 = vpop.f32.mrf.mxu0  ;;  %v1933_v39 = vpop.xlane.xlu1 %1932 }
 0x4cd   : > { %v2204_v46 = vmul.f32 %v2854_v10, %v2503_v61 }
 0x4ce   : > { %v2505_v57 = vpop.f32.mrf.mxu0 }
 0x4cf   : > { %2236 = vst.msk [vmem:[%s3868_s5 + $0x70] sm:$0xff] %vm1047_vm0, %v2204_v46  ;;  %v2506_v2 = vadd.f32 %v2505_v57, %v2504_v24  ;;  %v2876_v46 = vpop.eup %2875 }
 0x4d0   : > { %v1936_v45 = vpop.xlane.xlu0 %1935  ;;  %v1939_v61 = vpop.xlane.xlu1 %1938 }
 0x4d1   : > { %v2205_v32 = vmul.f32 %v2856_v27, %v2506_v2  ;;  %2877 = vrcp.f32 %v1939_v61 }
 0x4d2   : > { %2879 = vrcp.f32 %v1933_v39 }
 0x4d3   : > { %2237 = vst.msk [vmem:[%s3868_s5 + $0x78] sm:$0xff] %vm1047_vm0, %v2205_v32 }
 0x4d4   : > { %v2507_v19 = vpop.f32.mrf.mxu0  ;;  %v1942_v57 = vpop.xlane.xlu0 %1941 }
 0x4d5   : > { %2881 = vrcp.f32 %v1942_v57  ;;  %v1945_v27 = vpop.xlane.xlu1 %1944 }
 0x4d6   : > { %v2508_v13 = vpop.f32.mrf.mxu0  ;;  %2883 = vrcp.f32 %v1936_v45 }
 0x4d7   : > { %v2509_v47 = vadd.f32 %v2508_v13, %v2507_v19  ;;  %2885 = vrcp.f32 %v1945_v27 }
 0x4d8   : > { %v2510_v1 = vpop.f32.mrf.mxu0  ;;  %v1948_v34 = vpop.xlane.xlu0 %1947 }
 0x4d9   : > { %v2206_v14 = vmul.f32 %v2858_v18, %v2509_v47  ;;  %2887 = vrcp.f32 %v1948_v34 }
 0x4da   : > { %v2511_v28 = vpop.f32.mrf.mxu0 }
 0x4db   : > { %2238 = vst.msk [vmem:[%s3868_s5 + $0x80] sm:$0xff] %vm1047_vm0, %v2206_v14  ;;  %v2512_v48 = vadd.f32 %v2511_v28, %v2510_v1 }
 0x4dc   : > { %v2513_v15 = vpop.f32.mrf.mxu0 }
 0x4dd   : > { %v2207_v26 = vmul.f32 %v2860_v43, %v2512_v48 }
 0x4de   : > { %v2514_v23 = vpop.f32.mrf.mxu0  ;;  %v2878_v47 = vpop.eup %2877 }
 0x4df   : > { %2239 = vst.msk [vmem:[%s3868_s5 + $0x88] sm:$0xff] %vm1047_vm0, %v2207_v26  ;;  %v2515_v40 = vadd.f32 %v2514_v23, %v2513_v15  ;;  %v2880_v48 = vpop.eup %2879 }
 0x4e0   : > { %v2516_v31 = vpop.f32.mrf.mxu0 }
 0x4e1   : > { %v2208_v4 = vmul.f32 %v2862_v53, %v2515_v40 }
 0x4e2   : > { %v2517_v20 = vpop.f32.mrf.mxu0  ;;  %v2882_v15 = vpop.eup %2881 }
 0x4e3   : > { %2240 = vst.msk [vmem:[%s3868_s5 + $0x90] sm:$0xff] %vm1047_vm0, %v2208_v4  ;;  %v2518_v60 = vadd.f32 %v2517_v20, %v2516_v31  ;;  %v2884_v4 = vpop.eup %2883 }
 0x4e4   : > { %v2519_v3 = vpop.f32.mrf.mxu0 }
 0x4e5   : > { %v2209_v42 = vmul.f32 %v2864_v0, %v2518_v60  ;;  %v2886_v60 = vpop.eup %2885 }
 0x4e6   : > { %v2520_v36 = vpop.f32.mrf.mxu0 }
 0x4e7   : > { %2241 = vst.msk [vmem:[%s3868_s5 + $0x98] sm:$0xff] %vm1047_vm0, %v2209_v42  ;;  %v2521_v62 = vadd.f32 %v2520_v36, %v2519_v3 }
 0x4e8   : > { %v2522_v22 = vpop.f32.mrf.mxu0 }
 0x4e9   : > { %v2210_v29 = vmul.f32 %v2866_v59, %v2521_v62  ;;  %v2888_v62 = vpop.eup %2887 }
 0x4ea   : > { %v2523_v37 = vpop.f32.mrf.mxu0 }
 0x4eb   : > { %2242 = vst.msk [vmem:[%s3868_s5 + $0xa0] sm:$0xff] %vm1047_vm0, %v2210_v29  ;;  %v2524_v21 = vadd.f32 %v2523_v37, %v2522_v22 }
 0x4ec   : > { %v2525_v38 = vpop.f32.mrf.mxu0 }
 0x4ed   : > { %v2211_v41 = vmul.f32 %v2868_v9, %v2524_v21 }
 0x4ee   : > { %v2526_v25 = vpop.f32.mrf.mxu0 }
 0x4ef   : > { %2243 = vst.msk [vmem:[%s3868_s5 + $0xa8] sm:$0xff] %vm1047_vm0, %v2211_v41  ;;  %v2527_v54 = vadd.f32 %v2526_v25, %v2525_v38 }
 0x4f0   : > { %v2528_v55 = vpop.f32.mrf.mxu0 }
 0x4f1   : > { %v2212_v5 = vmul.f32 %v2870_v8, %v2527_v54 }
 0x4f2   : > { %v2529_v50 = vpop.f32.mrf.mxu0 }
 0x4f3   : > { %2244 = vst.msk [vmem:[%s3868_s5 + $0xb0] sm:$0xff] %vm1047_vm0, %v2212_v5  ;;  %v2530_v56 = vadd.f32 %v2529_v50, %v2528_v55 }
 0x4f4   : > { %v2531_v33 = vpop.f32.mrf.mxu0 }
 0x4f5   : > { %v2213_v63 = vmul.f32 %v2872_v7, %v2530_v56 }
 0x4f6   : > { %v2532_v11 = vpop.f32.mrf.mxu0 }
 0x4f7   : > { %2245 = vst.msk [vmem:[%s3868_s5 + $0xb8] sm:$0xff] %vm1047_vm0, %v2213_v63  ;;  %v2533_v35 = vadd.f32 %v2532_v11, %v2531_v33 }
 0x4f8   : > { %v2534_v51 = vpop.f32.mrf.mxu0 }
 0x4f9   : > { %v2214_v10 = vmul.f32 %v2874_v58, %v2533_v35 }
 0x4fa   : > { %v2535_v24 = vpop.f32.mrf.mxu0 }
 0x4fb   : > { %2246 = vst.msk [vmem:[%s3868_s5 + $0xc0] sm:$0xff] %vm1047_vm0, %v2214_v10  ;;  %v2536_v6 = vadd.f32 %v2535_v24, %v2534_v51 }
 0x4fd   : > { %v2215_v2 = vmul.f32 %v2876_v46, %v2536_v6 }
 0x4ff   : > { %2247 = vst.msk [vmem:[%s3868_s5 + $0xc8] sm:$0xff] %vm1047_vm0, %v2215_v2 }
 0x506   : > { %v2543_v32 = vpop.f32.mrf.mxu1 }
 0x508   : > { %v2544_v12 = vpop.f32.mrf.mxu1 }
 0x509   : > { %v2545_v19 = vadd.f32 %v2544_v12, %v2543_v32  ;;  %v2537_v13 = vpop.f32.mrf.mxu0 }
 0x50a   : > { %v2546_v18 = vpop.f32.mrf.mxu1 }
 0x50b   : > { %v2218_v16 = vmul.f32 %v2878_v47, %v2545_v19  ;;  %v2538_v1 = vpop.f32.mrf.mxu0 }
 0x50c   : > { %v2539_v14 = vadd.f32 %v2538_v1, %v2537_v13  ;;  %v2547_v28 = vpop.f32.mrf.mxu1 }
 0x50d   : > { %2250 = vst.msk [vmem:[%s3868_s5 + $0xe0] sm:$0xff] %vm1047_vm0, %v2218_v16  ;;  %v2548_v43 = vadd.f32 %v2547_v28, %v2546_v18  ;;  %v2540_v49 = vpop.f32.mrf.mxu0 }
 0x50e   : > { %v2216_v26 = vmul.f32 %v2880_v48, %v2539_v14  ;;  %v2549_v23 = vpop.f32.mrf.mxu1 }
 0x50f   : > { %v2219_v40 = vmul.f32 %v2882_v15, %v2548_v43  ;;  %v2541_v53 = vpop.f32.mrf.mxu0 }
 0x510   : > { %2248 = vst.msk [vmem:[%s3868_s5 + $0xd0] sm:$0xff] %vm1047_vm0, %v2216_v26  ;;  %v2542_v44 = vadd.f32 %v2541_v53, %v2540_v49  ;;  %v2550_v31 = vpop.f32.mrf.mxu1 }
 0x511   : > { %2251 = vst.msk [vmem:[%s3868_s5 + $0xe8] sm:$0xff] %vm1047_vm0, %v2219_v40  ;;  %v2551_v20 = vadd.f32 %v2550_v31, %v2549_v23 }
 0x512   : > { %v2217_v0 = vmul.f32 %v2884_v4, %v2542_v44  ;;  %v2552_v17 = vpop.f32.mrf.mxu1 }
 0x513   : > { %v2220_v3 = vmul.f32 %v2886_v60, %v2551_v20 }
 0x514   : > { %2249 = vst.msk [vmem:[%s3868_s5 + $0xd8] sm:$0xff] %vm1047_vm0, %v2217_v0  ;;  %v2553_v42 = vpop.f32.mrf.mxu1 }
 0x515   : > { %2252 = vst.msk [vmem:[%s3868_s5 + $0xf0] sm:$0xff] %vm1047_vm0, %v2220_v3  ;;  %v2554_v36 = vadd.f32 %v2553_v42, %v2552_v17 }
 0x517   : > { %v2221_v59 = vmul.f32 %v2888_v62, %v2554_v36 }
 0x519   : > { %2253 = vst.msk [vmem:[%s3868_s5 + $0xf8] sm:$0xff] %vm1047_vm0, %v2221_v59 }
 0x51a PF: > { %p12_p9 = scmp.ge.s32.totalorder %s2995_s14, 4   ;;  %s4002_s9 = smov %s2943_s10 }
 0x51b   : > { %s4003_s10 = smov %s2947_s11  ;;  %s4004_s11 = smov %s3005_s17 }
 0x51c   : > { %s4005_s12 = smov %s2995_s14  ;;  %14 = sbr.rel (!%p12_p9) target bundleno = 3 (0x3), region = 68 }
 0x521   :  { %2275 = vsyncpa [#allocation3], 1 }
 0x522   :  { %2277 = vsyncpa [#allocation3 + $0x1], 1 }

</bundles_post_ra>
